<compile_context>
chip_gen: v6e
topology: v6e:2x2x1
jax: 0.10.0
libtpu: 0.0.40
codegen_flags: <defaults>
</compile_context>

<pallas_src>
import jax
import jax.numpy as jnp
from jax import lax
from jax.experimental import pallas as pl
from jax.experimental.pallas import tpu as pltpu


# ---------------------------------------------------------------------------
# Model hyper-parameters (small, consistent with the module's __init__)
# ---------------------------------------------------------------------------
BATCH = 8
CATE_FEA_UNIQUES = [10, 20, 30, 40]          # 4 sparse features
NUM_FEA_SIZE = 16                            # dense feature dim
EMB_SIZE = 8
HIDDEN_DIM = 32
NUM_LAYERS = 2                               # kernel below hardcodes 2 layers
NUM_CLASSES = 1
N_NODES = 16                                 # graph nodes
GRAPH_FEAT_DIM = 8                           # graph_feature.shape[1]
GNN_HIDDEN = 16                              # gnn_hidden_size
NUM_HEADS = 4
BN_EPS = 1e-5

assert NUM_LAYERS == 2, "fused kernel hardcodes the 2-layer DNN tower"


def _vmem():
    return pl.BlockSpec(memory_space=pltpu.MemorySpace.VMEM)


# ---------------------------------------------------------------------------
# Fused forward kernel (everything VMEM-resident, single invocation, no grid)
# ---------------------------------------------------------------------------
def wide_deep_kernel(
    # inputs
    x_id_ref, x_sparse_ref, x_dense_ref,
    emb0_ref, emb1_ref, emb2_ref, emb3_ref,
    wide_w_ref, wide_b_ref,
    dnn1_w_ref, dnn1_b_ref,
    dnn2_w_ref, dnn2_b_ref,
    dnn_out_w_ref, dnn_out_b_ref,
    gfeat_ref, adj_ref,
    gat1_w_ref, gat1_al_ref, gat1_ar_ref, gat1_b_ref,
    gat2_w_ref, gat2_al_ref, gat2_ar_ref, gat2_b_ref,
    gate_w1_ref, gate_b1_ref, gate_w2_ref, gate_b2_ref, gate_w3_ref, gate_b3_ref,
    gate_woa_ref, gate_wob_ref, gate_woc_ref, gate_bo_ref,
    # output
    o_ref,
    # scratch
    h1_scratch,
):
    f32 = jnp.float32

    def recip(x):                         # EUP reciprocal (free slot)
        return pl.reciprocal(x, approx=True)

    def sigmoid(x):
        return recip(1.0 + jnp.exp(-x))

    def one_hot(idx_col, n):
        # idx_col: (rows, 1) int32 -> (rows, n) f32 one-hot
        iota = lax.broadcasted_iota(jnp.int32, (1, n), 1)
        return (idx_col == iota).astype(f32)

    x_dense = x_dense_ref[...]                              # (B, 16)
    x_sparse = x_sparse_ref[...]                            # (B, 4) int32
    commit_col = x_id_ref[...][:, 1:2]                      # (B, 1) int32

    # ---------------- wide branch ----------------
    wide_out = (jnp.dot(x_dense, wide_w_ref[...], preferred_element_type=f32)
                + wide_b_ref[...])                          # (B, emb)

    # ---------------- deep branch ----------------
    # Input concat [emb0|emb1|emb2|emb3|dense] @ W1 expressed as split-weight
    # matmul sums (no lane concat). Embedding lookups = one-hot matmuls.
    dnn1_w = dnn1_w_ref[...]                                # (48, 32), BN folded
    sparse_rows = len(CATE_FEA_UNIQUES) * EMB_SIZE
    acc = jnp.dot(x_dense, dnn1_w[sparse_rows:, :], preferred_element_type=f32)
    emb_refs = (emb0_ref, emb1_ref, emb2_ref, emb3_ref)
    for i, (tab_ref, voc) in enumerate(zip(emb_refs, CATE_FEA_UNIQUES)):
        oh = one_hot(x_sparse[:, i:i + 1], voc)             # (B, voc)
        emb_i = jnp.dot(oh, tab_ref[...], preferred_element_type=f32)   # (B, emb)
        acc = acc + jnp.dot(emb_i, dnn1_w[i * EMB_SIZE:(i + 1) * EMB_SIZE, :],
                            preferred_element_type=f32)
    # Linear -> BN(eval, folded) -> ReLU -> Dropout(identity), x2
    dnn_out = jnp.maximum(acc + dnn1_b_ref[...], 0.0)
    dnn_out = jnp.maximum(
        jnp.dot(dnn_out, dnn2_w_ref[...], preferred_element_type=f32)
        + dnn2_b_ref[...], 0.0)
    deep_out = (jnp.dot(dnn_out, dnn_out_w_ref[...], preferred_element_type=f32)
                + dnn_out_b_ref[...])                       # (B, emb)

    # ---------------- GAT branch (dense adjacency) ----------------
    adj = adj_ref[...]                                      # (N_src, N_dst)
    edge_mask = (adj > 0).astype(f32)

    def gat_attention(f_head, el_col, er_row):
        # e[u,v] = leaky_relu(el[u] + er[v]); softmax over src u per dst v;
        # out[v] = sum_u alpha[u,v] * f_head[u]
        e = el_col + er_row                                 # (N_src, N_dst)
        e = jnp.where(e > 0, e, 0.2 * e)                    # LeakyReLU(0.2)
        e = jnp.where(adj > 0, e, f32(-1e30))               # mask non-edges
        m = jnp.max(e, axis=0, keepdims=True)
        p = jnp.exp(e - m) * edge_mask
        alpha = p * recip(jnp.sum(p, axis=0, keepdims=True))
        return lax.dot_general(alpha, f_head, (((0,), (0,)), ((), ())),
                               preferred_element_type=f32)  # (N_dst, D)

    # layer 1: NUM_HEADS heads. el/er for ALL heads with 2 matmuls against
    # block-arranged attention vectors (built host-side).
    feat1 = jnp.dot(gfeat_ref[...], gat1_w_ref[...],
                    preferred_element_type=f32)             # (N, H*D1)
    el1 = jnp.dot(feat1, gat1_al_ref[...], preferred_element_type=f32)   # (N, H)
    er1 = lax.dot_general(gat1_ar_ref[...], feat1, (((1,), (1,)), ((), ())),
                          preferred_element_type=f32)       # (H, N)
    for hd in range(NUM_HEADS):
        f_h = feat1[:, hd * GNN_HIDDEN:(hd + 1) * GNN_HIDDEN]
        h1_scratch[:, hd * GNN_HIDDEN:(hd + 1) * GNN_HIDDEN] = gat_attention(
            f_h, el1[:, hd:hd + 1], er1[hd:hd + 1, :])
    h1 = h1_scratch[...] + gat1_b_ref[...]                  # (N, H*D1)
    # view(N, heads*hidden) then ELU (fused; exp arg clamped to avoid overflow)
    h1 = jnp.where(h1 > 0, h1, jnp.exp(jnp.minimum(h1, 0.0)) - 1.0)

    # layer 2: single head, out_dim = EMB_SIZE (squeeze is implicit)
    feat2 = jnp.dot(h1, gat2_w_ref[...], preferred_element_type=f32)     # (N, emb)
    el2 = jnp.dot(feat2, gat2_al_ref[...], preferred_element_type=f32)   # (N, 1)
    er2 = lax.dot_general(gat2_ar_ref[...], feat2, (((1,), (1,)), ((), ())),
                          preferred_element_type=f32)                    # (1, N)
    gcn = gat_attention(feat2, el2, er2) + gat2_b_ref[...]               # (N, emb)

    # gcn[commit_ids] as a one-hot matmul (row gather inside the kernel)
    gcn_out = jnp.dot(one_hot(commit_col, N_NODES), gcn,
                      preferred_element_type=f32)           # (B, emb)

    # ---------------- Gate (method='concat') + output softmax ----------------
    A, B, C = wide_out, deep_out, gcn_out
    aw = sigmoid(jnp.dot(A, gate_w1_ref[...], preferred_element_type=f32)
                 + gate_b1_ref[...])
    bw = sigmoid(jnp.dot(B, gate_w2_ref[...], preferred_element_type=f32)
                 + gate_b2_ref[...])
    cw = sigmoid(jnp.dot(C, gate_w3_ref[...], preferred_element_type=f32)
                 + gate_b3_ref[...])
    inv_tot = recip(aw + bw + cw)
    # concat([a*A, b*B, c*C]) @ Wo == a*A @ Wo_a + b*B @ Wo_b + c*C @ Wo_c
    z = (jnp.dot((aw * inv_tot) * A, gate_woa_ref[...], preferred_element_type=f32)
         + jnp.dot((bw * inv_tot) * B, gate_wob_ref[...], preferred_element_type=f32)
         + jnp.dot((cw * inv_tot) * C, gate_woc_ref[...], preferred_element_type=f32)
         + gate_bo_ref[...])                                # (B, num_classes)
    # softmax over dim=1 (class axis) — degenerate (==1.0) when NUM_CLASSES==1,
    # exactly mirroring the PyTorch module.
    z = z - jnp.max(z, axis=1, keepdims=True)
    ez = jnp.exp(z)
    o_ref[...] = ez * recip(jnp.sum(ez, axis=1, keepdims=True))


# ---------------------------------------------------------------------------
# pallas_call wrapper (single fused call, everything as VMEM inputs)
# ---------------------------------------------------------------------------
def wide_deep_forward(params, X_id, X_sparse, X_dense):
    args = (
        X_id, X_sparse, X_dense,
        params["emb_tables"][0], params["emb_tables"][1],
        params["emb_tables"][2], params["emb_tables"][3],
        params["wide_w"], params["wide_b"],
        params["dnn1_w"], params["dnn1_b"],
        params["dnn2_w"], params["dnn2_b"],
        params["dnn_out_w"], params["dnn_out_b"],
        params["graph_feature"], params["adj"],
        params["gat1_w"], params["gat1_al_blk"], params["gat1_ar_blk"], params["gat1_b"],
        params["gat2_w"], params["gat2_al"], params["gat2_ar"], params["gat2_b"],
        params["gate_w1"], params["gate_b1"], params["gate_w2"], params["gate_b2"],
        params["gate_w3"], params["gate_b3"],
        params["gate_wo_a"], params["gate_wo_b"], params["gate_wo_c"], params["gate_bo"],
    )
    return pl.pallas_call(
        wide_deep_kernel,
        out_shape=jax.ShapeDtypeStruct((X_dense.shape[0], NUM_CLASSES), jnp.float32),
        in_specs=[_vmem()] * len(args),
        out_specs=_vmem(),
        scratch_shapes=[pltpu.VMEM((N_NODES, NUM_HEADS * GNN_HIDDEN), jnp.float32)],
    )(*args)


# ---------------------------------------------------------------------------
# Parameter construction (deterministic, xavier-normal style)
# ---------------------------------------------------------------------------
def xavier_normal(key, fan_in, fan_out):
    std = (2.0 / (fan_in + fan_out)) ** 0.5
    return std * jax.random.normal(key, (fan_in, fan_out), dtype=jnp.float32)


def build_params(key):
    keys = iter(jax.random.split(key, 64))
    p = {}

    # sparse embedding tables
    p["emb_tables"] = [xavier_normal(next(keys), voc, EMB_SIZE)
                       for voc in CATE_FEA_UNIQUES]

    # wide linear: Linear(num_fea_size, emb_size)
    p["wide_w"] = xavier_normal(next(keys), NUM_FEA_SIZE, EMB_SIZE)
    p["wide_b"] = 0.01 * jax.random.normal(next(keys), (1, EMB_SIZE), jnp.float32)

    # DNN tower — fold eval-mode BatchNorm (gamma=1, beta=0, mean=0, var=1)
    # into the linear weights/biases: W' = W*scale, b' = b*scale + shift.
    all_dims = ([len(CATE_FEA_UNIQUES) * EMB_SIZE + NUM_FEA_SIZE]
                + [HIDDEN_DIM] * NUM_LAYERS)
    folded = []
    for i in range(1, len(all_dims)):
        w = xavier_normal(next(keys), all_dims[i - 1], all_dims[i])
        b = 0.01 * jax.random.normal(next(keys), (1, all_dims[i]), jnp.float32)
        gamma = jnp.ones((1, all_dims[i]), jnp.float32)
        beta = jnp.zeros((1, all_dims[i]), jnp.float32)
        run_mean = jnp.zeros((1, all_dims[i]), jnp.float32)
        run_var = jnp.ones((1, all_dims[i]), jnp.float32)
        scale = gamma / jnp.sqrt(run_var + BN_EPS)
        shift = beta - run_mean * scale
        folded.append((w * scale, b * scale + shift))
    p["dnn1_w"], p["dnn1_b"] = folded[0]
    p["dnn2_w"], p["dnn2_b"] = folded[1]

    # dnn_linear: Linear(all_dims[-1], emb_size)
    p["dnn_out_w"] = xavier_normal(next(keys), all_dims[-1], EMB_SIZE)
    p["dnn_out_b"] = 0.01 * jax.random.normal(next(keys), (1, EMB_SIZE), jnp.float32)

    # GAT layer 1: GATConv(graph_feat_dim, gnn_hidden, num_heads)
    p["gat1_w"] = xavier_normal(next(keys), GRAPH_FEAT_DIM, GNN_HIDDEN * NUM_HEADS)
    al1 = 0.1 * jax.random.normal(next(keys), (NUM_HEADS, GNN_HIDDEN), jnp.float32)
    ar1 = 0.1 * jax.random.normal(next(keys), (NUM_HEADS, GNN_HIDDEN), jnp.float32)

    def row_blocks(a, d):
        # (H, D) -> (H, H*D): row h holds a[h] at cols h*D:(h+1)*D
        h = a.shape[0]
        blk = jnp.zeros((h, h * d), jnp.float32)
        for i in range(h):
            blk = blk.at[i, i * d:(i + 1) * d].set(a[i])
        return blk

    p["gat1_al_blk"] = row_blocks(al1, GNN_HIDDEN).T   # (H*D, H): feat @ -> (N, H)
    p["gat1_ar_blk"] = row_blocks(ar1, GNN_HIDDEN)     # (H, H*D): contract -> (H, N)
    p["gat1_b"] = jnp.zeros((1, GNN_HIDDEN * NUM_HEADS), jnp.float32)

    # GAT layer 2: GATConv(gnn_hidden*num_heads, emb_size, 1)
    p["gat2_w"] = xavier_normal(next(keys), GNN_HIDDEN * NUM_HEADS, EMB_SIZE)
    p["gat2_al"] = 0.1 * jax.random.normal(next(keys), (EMB_SIZE, 1), jnp.float32)
    p["gat2_ar"] = 0.1 * jax.random.normal(next(keys), (1, EMB_SIZE), jnp.float32)
    p["gat2_b"] = jnp.zeros((1, EMB_SIZE), jnp.float32)

    # Gate (method='concat'); output weight split into three blocks so the
    # kernel avoids the lane-axis concat.
    p["gate_w1"] = xavier_normal(next(keys), EMB_SIZE, 1)
    p["gate_b1"] = 0.01 * jax.random.normal(next(keys), (1, 1), jnp.float32)
    p["gate_w2"] = xavier_normal(next(keys), EMB_SIZE, 1)
    p["gate_b2"] = 0.01 * jax.random.normal(next(keys), (1, 1), jnp.float32)
    p["gate_w3"] = xavier_normal(next(keys), EMB_SIZE, 1)
    p["gate_b3"] = 0.01 * jax.random.normal(next(keys), (1, 1), jnp.float32)
    wo = xavier_normal(next(keys), EMB_SIZE * 3, NUM_CLASSES)
    p["gate_wo_a"] = wo[:EMB_SIZE]
    p["gate_wo_b"] = wo[EMB_SIZE:2 * EMB_SIZE]
    p["gate_wo_c"] = wo[2 * EMB_SIZE:]
    p["gate_bo"] = 0.01 * jax.random.normal(next(keys), (1, NUM_CLASSES), jnp.float32)

    # graph: ring + reverse ring + self loops, dense [src, dst] mask
    idx = jnp.arange(N_NODES)
    adj = jnp.zeros((N_NODES, N_NODES), jnp.float32)
    adj = adj.at[idx, idx].set(1.0)
    adj = adj.at[idx, (idx + 1) % N_NODES].set(1.0)
    adj = adj.at[(idx + 1) % N_NODES, idx].set(1.0)
    p["adj"] = adj
    p["graph_feature"] = jax.random.normal(
        next(keys), (N_NODES, GRAPH_FEAT_DIM), jnp.float32)
    return p


# ---------------------------------------------------------------------------
if __name__ == "__main__":
    key = jax.random.PRNGKey(0)
    k_param, k_id, k_sparse, k_dense = jax.random.split(key, 4)

    params = build_params(k_param)

    X_id = jnp.stack(
        [
            jnp.arange(BATCH, dtype=jnp.int32),
            jax.random.randint(k_id, (BATCH,), 0, N_NODES, dtype=jnp.int32),
        ],
        axis=1,
    )                                                    # (BATCH, 2)
    X_sparse = jnp.stack(
        [
            jax.random.randint(jax.random.fold_in(k_sparse, i), (BATCH,), 0, voc,
                               dtype=jnp.int32)
            for i, voc in enumerate(CATE_FEA_UNIQUES)
        ],
        axis=1,
    )                                                    # (BATCH, 4)
    X_dense = jax.random.normal(k_dense, (BATCH, NUM_FEA_SIZE), jnp.float32)

    out = wide_deep_forward(params, X_id, X_sparse, X_dense)
    out = jax.block_until_ready(out)
    assert out.shape == (BATCH, NUM_CLASSES)
    assert bool(jnp.all(jnp.isfinite(out)))
    print("KERNEL_OK")
</pallas_src>

<mosaic_0001>
module attributes {stable_mosaic.version = 11 : i64} {
  func.func @wide_deep_kernel(%arg0: memref<8x2xi32, #tpu.memory_space<vmem>>, %arg1: memref<8x4xi32, #tpu.memory_space<vmem>>, %arg2: memref<8x16xf32, #tpu.memory_space<vmem>>, %arg3: memref<10x8xf32, #tpu.memory_space<vmem>>, %arg4: memref<20x8xf32, #tpu.memory_space<vmem>>, %arg5: memref<30x8xf32, #tpu.memory_space<vmem>>, %arg6: memref<40x8xf32, #tpu.memory_space<vmem>>, %arg7: memref<16x8xf32, #tpu.memory_space<vmem>>, %arg8: memref<1x8xf32, #tpu.memory_space<vmem>>, %arg9: memref<48x32xf32, #tpu.memory_space<vmem>>, %arg10: memref<1x32xf32, #tpu.memory_space<vmem>>, %arg11: memref<32x32xf32, #tpu.memory_space<vmem>>, %arg12: memref<1x32xf32, #tpu.memory_space<vmem>>, %arg13: memref<32x8xf32, #tpu.memory_space<vmem>>, %arg14: memref<1x8xf32, #tpu.memory_space<vmem>>, %arg15: memref<16x8xf32, #tpu.memory_space<vmem>>, %arg16: memref<16x16xf32, #tpu.memory_space<vmem>>, %arg17: memref<8x64xf32, #tpu.memory_space<vmem>>, %arg18: memref<64x4xf32, #tpu.memory_space<vmem>>, %arg19: memref<4x64xf32, #tpu.memory_space<vmem>>, %arg20: memref<1x64xf32, #tpu.memory_space<vmem>>, %arg21: memref<64x8xf32, #tpu.memory_space<vmem>>, %arg22: memref<8x1xf32, #tpu.memory_space<vmem>>, %arg23: memref<1x8xf32, #tpu.memory_space<vmem>>, %arg24: memref<1x8xf32, #tpu.memory_space<vmem>>, %arg25: memref<8x1xf32, #tpu.memory_space<vmem>>, %arg26: memref<1x1xf32, #tpu.memory_space<vmem>>, %arg27: memref<8x1xf32, #tpu.memory_space<vmem>>, %arg28: memref<1x1xf32, #tpu.memory_space<vmem>>, %arg29: memref<8x1xf32, #tpu.memory_space<vmem>>, %arg30: memref<1x1xf32, #tpu.memory_space<vmem>>, %arg31: memref<8x1xf32, #tpu.memory_space<vmem>>, %arg32: memref<8x1xf32, #tpu.memory_space<vmem>>, %arg33: memref<8x1xf32, #tpu.memory_space<vmem>>, %arg34: memref<1x1xf32, #tpu.memory_space<vmem>>, %arg35: memref<8x1xf32, #tpu.memory_space<vmem>>, %arg36: memref<16x64xf32, #tpu.memory_space<vmem>>) attributes {dimension_semantics = [], scalar_prefetch = 0 : i64, scratch_operands = 1 : i64, tpu.core_type = #tpu.core_type<tc>} {
    %c0 = arith.constant 0 : index
    %c0_0 = arith.constant 0 : index
    %0 = vector.load %arg2[%c0, %c0_0] : memref<8x16xf32, #tpu.memory_space<vmem>>, vector<8x16xf32>
    %c0_1 = arith.constant 0 : index
    %c0_2 = arith.constant 0 : index
    %1 = vector.load %arg1[%c0_1, %c0_2] : memref<8x4xi32, #tpu.memory_space<vmem>>, vector<8x4xi32>
    %c0_3 = arith.constant 0 : index
    %c0_4 = arith.constant 0 : index
    %2 = vector.load %arg0[%c0_3, %c0_4] : memref<8x2xi32, #tpu.memory_space<vmem>>, vector<8x2xi32>
    %3 = vector.extract_strided_slice %2 {offsets = [0, 1], sizes = [8, 1], strides = [1, 1]} : vector<8x2xi32> to vector<8x1xi32>
    %c0_5 = arith.constant 0 : index
    %c0_6 = arith.constant 0 : index
    %4 = vector.load %arg7[%c0_5, %c0_6] : memref<16x8xf32, #tpu.memory_space<vmem>>, vector<16x8xf32>
    %cst = arith.constant dense<0.000000e+00> : vector<8x8xf32>
    %5 = tpu.matmul %0, %4, %cst {dimension_numbers = #tpu.dot_dimension_numbers<[1], [0], [0], [1], [0, 0, 1, 1], [], []>} : vector<8x16xf32>, vector<16x8xf32>, vector<8x8xf32> -> vector<8x8xf32>
    %c0_7 = arith.constant 0 : index
    %c0_8 = arith.constant 0 : index
    %6 = vector.load %arg8[%c0_7, %c0_8] : memref<1x8xf32, #tpu.memory_space<vmem>>, vector<1x8xf32>
    %7 = vector.broadcast %6 : vector<1x8xf32> to vector<8x8xf32>
    %8 = arith.addf %5, %7 : vector<8x8xf32>
    %c0_9 = arith.constant 0 : index
    %c0_10 = arith.constant 0 : index
    %9 = vector.load %arg9[%c0_9, %c0_10] : memref<48x32xf32, #tpu.memory_space<vmem>>, vector<48x32xf32>
    %10 = vector.extract_strided_slice %9 {offsets = [32, 0], sizes = [16, 32], strides = [1, 1]} : vector<48x32xf32> to vector<16x32xf32>
    %cst_11 = arith.constant dense<0.000000e+00> : vector<8x32xf32>
    %11 = tpu.matmul %0, %10, %cst_11 {dimension_numbers = #tpu.dot_dimension_numbers<[1], [0], [0], [1], [0, 0, 1, 1], [], []>} : vector<8x16xf32>, vector<16x32xf32>, vector<8x32xf32> -> vector<8x32xf32>
    %12 = vector.extract_strided_slice %1 {offsets = [0, 0], sizes = [8, 1], strides = [1, 1]} : vector<8x4xi32> to vector<8x1xi32>
    %13 = tpu.iota {dimensions = array<i32: 1>} : vector<1x10xi32>
    %14 = vector.broadcast %12 : vector<8x1xi32> to vector<8x10xi32>
    %15 = vector.broadcast %13 : vector<1x10xi32> to vector<8x10xi32>
    %16 = arith.cmpi eq, %14, %15 : vector<8x10xi32>
    %17 = arith.extui %16 : vector<8x10xi1> to vector<8x10xi32>
    %18 = arith.sitofp %17 : vector<8x10xi32> to vector<8x10xf32>
    %c0_12 = arith.constant 0 : index
    %c0_13 = arith.constant 0 : index
    %19 = vector.load %arg3[%c0_12, %c0_13] : memref<10x8xf32, #tpu.memory_space<vmem>>, vector<10x8xf32>
    %cst_14 = arith.constant dense<0.000000e+00> : vector<8x8xf32>
    %20 = tpu.matmul %18, %19, %cst_14 {dimension_numbers = #tpu.dot_dimension_numbers<[1], [0], [0], [1], [0, 0, 1, 1], [], []>} : vector<8x10xf32>, vector<10x8xf32>, vector<8x8xf32> -> vector<8x8xf32>
    %21 = vector.extract_strided_slice %9 {offsets = [0, 0], sizes = [8, 32], strides = [1, 1]} : vector<48x32xf32> to vector<8x32xf32>
    %cst_15 = arith.constant dense<0.000000e+00> : vector<8x32xf32>
    %22 = tpu.matmul %20, %21, %cst_15 {dimension_numbers = #tpu.dot_dimension_numbers<[1], [0], [0], [1], [0, 0, 1, 1], [], []>} : vector<8x8xf32>, vector<8x32xf32>, vector<8x32xf32> -> vector<8x32xf32>
    %23 = arith.addf %11, %22 : vector<8x32xf32>
    %24 = vector.extract_strided_slice %1 {offsets = [0, 1], sizes = [8, 1], strides = [1, 1]} : vector<8x4xi32> to vector<8x1xi32>
    %25 = tpu.iota {dimensions = array<i32: 1>} : vector<1x20xi32>
    %26 = vector.broadcast %24 : vector<8x1xi32> to vector<8x20xi32>
    %27 = vector.broadcast %25 : vector<1x20xi32> to vector<8x20xi32>
    %28 = arith.cmpi eq, %26, %27 : vector<8x20xi32>
    %29 = arith.extui %28 : vector<8x20xi1> to vector<8x20xi32>
    %30 = arith.sitofp %29 : vector<8x20xi32> to vector<8x20xf32>
    %c0_16 = arith.constant 0 : index
    %c0_17 = arith.constant 0 : index
    %31 = vector.load %arg4[%c0_16, %c0_17] : memref<20x8xf32, #tpu.memory_space<vmem>>, vector<20x8xf32>
    %cst_18 = arith.constant dense<0.000000e+00> : vector<8x8xf32>
    %32 = tpu.matmul %30, %31, %cst_18 {dimension_numbers = #tpu.dot_dimension_numbers<[1], [0], [0], [1], [0, 0, 1, 1], [], []>} : vector<8x20xf32>, vector<20x8xf32>, vector<8x8xf32> -> vector<8x8xf32>
    %33 = vector.extract_strided_slice %9 {offsets = [8, 0], sizes = [8, 32], strides = [1, 1]} : vector<48x32xf32> to vector<8x32xf32>
    %cst_19 = arith.constant dense<0.000000e+00> : vector<8x32xf32>
    %34 = tpu.matmul %32, %33, %cst_19 {dimension_numbers = #tpu.dot_dimension_numbers<[1], [0], [0], [1], [0, 0, 1, 1], [], []>} : vector<8x8xf32>, vector<8x32xf32>, vector<8x32xf32> -> vector<8x32xf32>
    %35 = arith.addf %23, %34 : vector<8x32xf32>
    %36 = vector.extract_strided_slice %1 {offsets = [0, 2], sizes = [8, 1], strides = [1, 1]} : vector<8x4xi32> to vector<8x1xi32>
    %37 = tpu.iota {dimensions = array<i32: 1>} : vector<1x30xi32>
    %38 = vector.broadcast %36 : vector<8x1xi32> to vector<8x30xi32>
    %39 = vector.broadcast %37 : vector<1x30xi32> to vector<8x30xi32>
    %40 = arith.cmpi eq, %38, %39 : vector<8x30xi32>
    %41 = arith.extui %40 : vector<8x30xi1> to vector<8x30xi32>
    %42 = arith.sitofp %41 : vector<8x30xi32> to vector<8x30xf32>
    %c0_20 = arith.constant 0 : index
    %c0_21 = arith.constant 0 : index
    %43 = vector.load %arg5[%c0_20, %c0_21] : memref<30x8xf32, #tpu.memory_space<vmem>>, vector<30x8xf32>
    %cst_22 = arith.constant dense<0.000000e+00> : vector<8x8xf32>
    %44 = tpu.matmul %42, %43, %cst_22 {dimension_numbers = #tpu.dot_dimension_numbers<[1], [0], [0], [1], [0, 0, 1, 1], [], []>} : vector<8x30xf32>, vector<30x8xf32>, vector<8x8xf32> -> vector<8x8xf32>
    %45 = vector.extract_strided_slice %9 {offsets = [16, 0], sizes = [8, 32], strides = [1, 1]} : vector<48x32xf32> to vector<8x32xf32>
    %cst_23 = arith.constant dense<0.000000e+00> : vector<8x32xf32>
    %46 = tpu.matmul %44, %45, %cst_23 {dimension_numbers = #tpu.dot_dimension_numbers<[1], [0], [0], [1], [0, 0, 1, 1], [], []>} : vector<8x8xf32>, vector<8x32xf32>, vector<8x32xf32> -> vector<8x32xf32>
    %47 = arith.addf %35, %46 : vector<8x32xf32>
    %48 = vector.extract_strided_slice %1 {offsets = [0, 3], sizes = [8, 1], strides = [1, 1]} : vector<8x4xi32> to vector<8x1xi32>
    %49 = tpu.iota {dimensions = array<i32: 1>} : vector<1x40xi32>
    %50 = vector.broadcast %48 : vector<8x1xi32> to vector<8x40xi32>
    %51 = vector.broadcast %49 : vector<1x40xi32> to vector<8x40xi32>
    %52 = arith.cmpi eq, %50, %51 : vector<8x40xi32>
    %53 = arith.extui %52 : vector<8x40xi1> to vector<8x40xi32>
    %54 = arith.sitofp %53 : vector<8x40xi32> to vector<8x40xf32>
    %c0_24 = arith.constant 0 : index
    %c0_25 = arith.constant 0 : index
    %55 = vector.load %arg6[%c0_24, %c0_25] : memref<40x8xf32, #tpu.memory_space<vmem>>, vector<40x8xf32>
    %cst_26 = arith.constant dense<0.000000e+00> : vector<8x8xf32>
    %56 = tpu.matmul %54, %55, %cst_26 {dimension_numbers = #tpu.dot_dimension_numbers<[1], [0], [0], [1], [0, 0, 1, 1], [], []>} : vector<8x40xf32>, vector<40x8xf32>, vector<8x8xf32> -> vector<8x8xf32>
    %57 = vector.extract_strided_slice %9 {offsets = [24, 0], sizes = [8, 32], strides = [1, 1]} : vector<48x32xf32> to vector<8x32xf32>
    %cst_27 = arith.constant dense<0.000000e+00> : vector<8x32xf32>
    %58 = tpu.matmul %56, %57, %cst_27 {dimension_numbers = #tpu.dot_dimension_numbers<[1], [0], [0], [1], [0, 0, 1, 1], [], []>} : vector<8x8xf32>, vector<8x32xf32>, vector<8x32xf32> -> vector<8x32xf32>
    %59 = arith.addf %47, %58 : vector<8x32xf32>
    %c0_28 = arith.constant 0 : index
    %c0_29 = arith.constant 0 : index
    %60 = vector.load %arg10[%c0_28, %c0_29] : memref<1x32xf32, #tpu.memory_space<vmem>>, vector<1x32xf32>
    %61 = vector.broadcast %60 : vector<1x32xf32> to vector<8x32xf32>
    %62 = arith.addf %59, %61 : vector<8x32xf32>
    %cst_30 = arith.constant 0.000000e+00 : f32
    %63 = vector.broadcast %cst_30 : f32 to vector<8x32xf32>
    %64 = arith.maximumf %62, %63 : vector<8x32xf32>
    %c0_31 = arith.constant 0 : index
    %c0_32 = arith.constant 0 : index
    %65 = vector.load %arg11[%c0_31, %c0_32] : memref<32x32xf32, #tpu.memory_space<vmem>>, vector<32x32xf32>
    %cst_33 = arith.constant dense<0.000000e+00> : vector<8x32xf32>
    %66 = tpu.matmul %64, %65, %cst_33 {dimension_numbers = #tpu.dot_dimension_numbers<[1], [0], [0], [1], [0, 0, 1, 1], [], []>} : vector<8x32xf32>, vector<32x32xf32>, vector<8x32xf32> -> vector<8x32xf32>
    %c0_34 = arith.constant 0 : index
    %c0_35 = arith.constant 0 : index
    %67 = vector.load %arg12[%c0_34, %c0_35] : memref<1x32xf32, #tpu.memory_space<vmem>>, vector<1x32xf32>
    %68 = vector.broadcast %67 : vector<1x32xf32> to vector<8x32xf32>
    %69 = arith.addf %66, %68 : vector<8x32xf32>
    %cst_36 = arith.constant 0.000000e+00 : f32
    %70 = vector.broadcast %cst_36 : f32 to vector<8x32xf32>
    %71 = arith.maximumf %69, %70 : vector<8x32xf32>
    %c0_37 = arith.constant 0 : index
    %c0_38 = arith.constant 0 : index
    %72 = vector.load %arg13[%c0_37, %c0_38] : memref<32x8xf32, #tpu.memory_space<vmem>>, vector<32x8xf32>
    %cst_39 = arith.constant dense<0.000000e+00> : vector<8x8xf32>
    %73 = tpu.matmul %71, %72, %cst_39 {dimension_numbers = #tpu.dot_dimension_numbers<[1], [0], [0], [1], [0, 0, 1, 1], [], []>} : vector<8x32xf32>, vector<32x8xf32>, vector<8x8xf32> -> vector<8x8xf32>
    %c0_40 = arith.constant 0 : index
    %c0_41 = arith.constant 0 : index
    %74 = vector.load %arg14[%c0_40, %c0_41] : memref<1x8xf32, #tpu.memory_space<vmem>>, vector<1x8xf32>
    %75 = vector.broadcast %74 : vector<1x8xf32> to vector<8x8xf32>
    %76 = arith.addf %73, %75 : vector<8x8xf32>
    %c0_42 = arith.constant 0 : index
    %c0_43 = arith.constant 0 : index
    %77 = vector.load %arg16[%c0_42, %c0_43] : memref<16x16xf32, #tpu.memory_space<vmem>>, vector<16x16xf32>
    %cst_44 = arith.constant 0.000000e+00 : f32
    %78 = vector.broadcast %cst_44 : f32 to vector<16x16xf32>
    %79 = arith.cmpf ogt, %77, %78 : vector<16x16xf32>
    %80 = arith.extui %79 : vector<16x16xi1> to vector<16x16xi32>
    %81 = arith.sitofp %80 : vector<16x16xi32> to vector<16x16xf32>
    %c0_45 = arith.constant 0 : index
    %c0_46 = arith.constant 0 : index
    %82 = vector.load %arg15[%c0_45, %c0_46] : memref<16x8xf32, #tpu.memory_space<vmem>>, vector<16x8xf32>
    %c0_47 = arith.constant 0 : index
    %c0_48 = arith.constant 0 : index
    %83 = vector.load %arg17[%c0_47, %c0_48] : memref<8x64xf32, #tpu.memory_space<vmem>>, vector<8x64xf32>
    %cst_49 = arith.constant dense<0.000000e+00> : vector<16x64xf32>
    %84 = tpu.matmul %82, %83, %cst_49 {dimension_numbers = #tpu.dot_dimension_numbers<[1], [0], [0], [1], [0, 0, 1, 1], [], []>} : vector<16x8xf32>, vector<8x64xf32>, vector<16x64xf32> -> vector<16x64xf32>
    %c0_50 = arith.constant 0 : index
    %c0_51 = arith.constant 0 : index
    %85 = vector.load %arg18[%c0_50, %c0_51] : memref<64x4xf32, #tpu.memory_space<vmem>>, vector<64x4xf32>
    %cst_52 = arith.constant dense<0.000000e+00> : vector<16x4xf32>
    %86 = tpu.matmul %84, %85, %cst_52 {dimension_numbers = #tpu.dot_dimension_numbers<[1], [0], [0], [1], [0, 0, 1, 1], [], []>} : vector<16x64xf32>, vector<64x4xf32>, vector<16x4xf32> -> vector<16x4xf32>
    %c0_53 = arith.constant 0 : index
    %c0_54 = arith.constant 0 : index
    %87 = vector.load %arg19[%c0_53, %c0_54] : memref<4x64xf32, #tpu.memory_space<vmem>>, vector<4x64xf32>
    %cst_55 = arith.constant dense<0.000000e+00> : vector<4x16xf32>
    %88 = tpu.matmul %87, %84, %cst_55 {dimension_numbers = #tpu.dot_dimension_numbers<[1], [1], [0], [0], [0, 0, 1, 0], [], []>} : vector<4x64xf32>, vector<16x64xf32>, vector<4x16xf32> -> vector<4x16xf32>
    %89 = vector.extract_strided_slice %84 {offsets = [0, 0], sizes = [16, 16], strides = [1, 1]} : vector<16x64xf32> to vector<16x16xf32>
    %90 = vector.extract_strided_slice %86 {offsets = [0, 0], sizes = [16, 1], strides = [1, 1]} : vector<16x4xf32> to vector<16x1xf32>
    %91 = vector.extract_strided_slice %88 {offsets = [0, 0], sizes = [1, 16], strides = [1, 1]} : vector<4x16xf32> to vector<1x16xf32>
    %92 = vector.broadcast %90 : vector<16x1xf32> to vector<16x16xf32>
    %93 = vector.broadcast %91 : vector<1x16xf32> to vector<16x16xf32>
    %94 = arith.addf %92, %93 : vector<16x16xf32>
    %cst_56 = arith.constant 0.000000e+00 : f32
    %95 = vector.broadcast %cst_56 : f32 to vector<16x16xf32>
    %96 = arith.cmpf ogt, %94, %95 : vector<16x16xf32>
    %cst_57 = arith.constant 2.000000e-01 : f32
    %97 = vector.broadcast %cst_57 : f32 to vector<16x16xf32>
    %98 = arith.mulf %97, %94 : vector<16x16xf32>
    %99 = arith.select %96, %94, %98 : vector<16x16xi1>, vector<16x16xf32>
    %cst_58 = arith.constant 0.000000e+00 : f32
    %100 = vector.broadcast %cst_58 : f32 to vector<16x16xf32>
    %101 = arith.cmpf ogt, %77, %100 : vector<16x16xf32>
    %cst_59 = arith.constant -1.000000e+30 : f32
    %102 = vector.broadcast %cst_59 : f32 to vector<16x16xf32>
    %103 = arith.select %101, %99, %102 : vector<16x16xi1>, vector<16x16xf32>
    %cst_60 = arith.constant dense<0xFF800000> : vector<16xf32>
    %104 = vector.multi_reduction <maximumf>, %103, %cst_60 [0] : vector<16x16xf32> to vector<16xf32>
    %105 = vector.shape_cast %104 : vector<16xf32> to vector<1x16xf32>
    %106 = vector.broadcast %105 : vector<1x16xf32> to vector<16x16xf32>
    %107 = arith.subf %103, %106 : vector<16x16xf32>
    %108 = math.exp %107 : vector<16x16xf32>
    %109 = arith.mulf %108, %81 : vector<16x16xf32>
    %cst_61 = arith.constant dense<0.000000e+00> : vector<16xf32>
    %110 = vector.multi_reduction <add>, %109, %cst_61 [0] : vector<16x16xf32> to vector<16xf32>
    %111 = vector.shape_cast %110 : vector<16xf32> to vector<1x16xf32>
    %112 = tpu.reciprocal %111 {approx = true} : vector<1x16xf32> -> vector<1x16xf32>
    %113 = vector.broadcast %112 : vector<1x16xf32> to vector<16x16xf32>
    %114 = arith.mulf %109, %113 : vector<16x16xf32>
    %cst_62 = arith.constant dense<0.000000e+00> : vector<16x16xf32>
    %115 = tpu.matmul %114, %89, %cst_62 {dimension_numbers = #tpu.dot_dimension_numbers<[0], [0], [1], [1], [0, 1, 1, 1], [], []>} : vector<16x16xf32>, vector<16x16xf32>, vector<16x16xf32> -> vector<16x16xf32>
    %c0_63 = arith.constant 0 : index
    %c0_64 = arith.constant 0 : index
    %116 = vector.load %arg36[%c0_63, %c0_64] : memref<16x64xf32, #tpu.memory_space<vmem>>, vector<16x16xf32>
    tpu.vector_store %arg36[%c0_63, %c0_64], %115 {strides = array<i32>} : memref<16x64xf32, #tpu.memory_space<vmem>>, vector<16x16xf32>,
    %117 = vector.extract_strided_slice %84 {offsets = [0, 16], sizes = [16, 16], strides = [1, 1]} : vector<16x64xf32> to vector<16x16xf32>
    %118 = vector.extract_strided_slice %86 {offsets = [0, 1], sizes = [16, 1], strides = [1, 1]} : vector<16x4xf32> to vector<16x1xf32>
    %119 = vector.extract_strided_slice %88 {offsets = [1, 0], sizes = [1, 16], strides = [1, 1]} : vector<4x16xf32> to vector<1x16xf32>
    %120 = vector.broadcast %118 : vector<16x1xf32> to vector<16x16xf32>
    %121 = vector.broadcast %119 : vector<1x16xf32> to vector<16x16xf32>
    %122 = arith.addf %120, %121 : vector<16x16xf32>
    %cst_65 = arith.constant 0.000000e+00 : f32
    %123 = vector.broadcast %cst_65 : f32 to vector<16x16xf32>
    %124 = arith.cmpf ogt, %122, %123 : vector<16x16xf32>
    %cst_66 = arith.constant 2.000000e-01 : f32
    %125 = vector.broadcast %cst_66 : f32 to vector<16x16xf32>
    %126 = arith.mulf %125, %122 : vector<16x16xf32>
    %127 = arith.select %124, %122, %126 : vector<16x16xi1>, vector<16x16xf32>
    %cst_67 = arith.constant 0.000000e+00 : f32
    %128 = vector.broadcast %cst_67 : f32 to vector<16x16xf32>
    %129 = arith.cmpf ogt, %77, %128 : vector<16x16xf32>
    %cst_68 = arith.constant -1.000000e+30 : f32
    %130 = vector.broadcast %cst_68 : f32 to vector<16x16xf32>
    %131 = arith.select %129, %127, %130 : vector<16x16xi1>, vector<16x16xf32>
    %cst_69 = arith.constant dense<0xFF800000> : vector<16xf32>
    %132 = vector.multi_reduction <maximumf>, %131, %cst_69 [0] : vector<16x16xf32> to vector<16xf32>
    %133 = vector.shape_cast %132 : vector<16xf32> to vector<1x16xf32>
    %134 = vector.broadcast %133 : vector<1x16xf32> to vector<16x16xf32>
    %135 = arith.subf %131, %134 : vector<16x16xf32>
    %136 = math.exp %135 : vector<16x16xf32>
    %137 = arith.mulf %136, %81 : vector<16x16xf32>
    %cst_70 = arith.constant dense<0.000000e+00> : vector<16xf32>
    %138 = vector.multi_reduction <add>, %137, %cst_70 [0] : vector<16x16xf32> to vector<16xf32>
    %139 = vector.shape_cast %138 : vector<16xf32> to vector<1x16xf32>
    %140 = tpu.reciprocal %139 {approx = true} : vector<1x16xf32> -> vector<1x16xf32>
    %141 = vector.broadcast %140 : vector<1x16xf32> to vector<16x16xf32>
    %142 = arith.mulf %137, %141 : vector<16x16xf32>
    %cst_71 = arith.constant dense<0.000000e+00> : vector<16x16xf32>
    %143 = tpu.matmul %142, %117, %cst_71 {dimension_numbers = #tpu.dot_dimension_numbers<[0], [0], [1], [1], [0, 1, 1, 1], [], []>} : vector<16x16xf32>, vector<16x16xf32>, vector<16x16xf32> -> vector<16x16xf32>
    %c0_72 = arith.constant 0 : index
    %c16 = arith.constant 16 : index
    %144 = vector.load %arg36[%c0_72, %c16] : memref<16x64xf32, #tpu.memory_space<vmem>>, vector<16x16xf32>
    tpu.vector_store %arg36[%c0_72, %c16], %143 {strides = array<i32>} : memref<16x64xf32, #tpu.memory_space<vmem>>, vector<16x16xf32>,
    %145 = vector.extract_strided_slice %84 {offsets = [0, 32], sizes = [16, 16], strides = [1, 1]} : vector<16x64xf32> to vector<16x16xf32>
    %146 = vector.extract_strided_slice %86 {offsets = [0, 2], sizes = [16, 1], strides = [1, 1]} : vector<16x4xf32> to vector<16x1xf32>
    %147 = vector.extract_strided_slice %88 {offsets = [2, 0], sizes = [1, 16], strides = [1, 1]} : vector<4x16xf32> to vector<1x16xf32>
    %148 = vector.broadcast %146 : vector<16x1xf32> to vector<16x16xf32>
    %149 = vector.broadcast %147 : vector<1x16xf32> to vector<16x16xf32>
    %150 = arith.addf %148, %149 : vector<16x16xf32>
    %cst_73 = arith.constant 0.000000e+00 : f32
    %151 = vector.broadcast %cst_73 : f32 to vector<16x16xf32>
    %152 = arith.cmpf ogt, %150, %151 : vector<16x16xf32>
    %cst_74 = arith.constant 2.000000e-01 : f32
    %153 = vector.broadcast %cst_74 : f32 to vector<16x16xf32>
    %154 = arith.mulf %153, %150 : vector<16x16xf32>
    %155 = arith.select %152, %150, %154 : vector<16x16xi1>, vector<16x16xf32>
    %cst_75 = arith.constant 0.000000e+00 : f32
    %156 = vector.broadcast %cst_75 : f32 to vector<16x16xf32>
    %157 = arith.cmpf ogt, %77, %156 : vector<16x16xf32>
    %cst_76 = arith.constant -1.000000e+30 : f32
    %158 = vector.broadcast %cst_76 : f32 to vector<16x16xf32>
    %159 = arith.select %157, %155, %158 : vector<16x16xi1>, vector<16x16xf32>
    %cst_77 = arith.constant dense<0xFF800000> : vector<16xf32>
    %160 = vector.multi_reduction <maximumf>, %159, %cst_77 [0] : vector<16x16xf32> to vector<16xf32>
    %161 = vector.shape_cast %160 : vector<16xf32> to vector<1x16xf32>
    %162 = vector.broadcast %161 : vector<1x16xf32> to vector<16x16xf32>
    %163 = arith.subf %159, %162 : vector<16x16xf32>
    %164 = math.exp %163 : vector<16x16xf32>
    %165 = arith.mulf %164, %81 : vector<16x16xf32>
    %cst_78 = arith.constant dense<0.000000e+00> : vector<16xf32>
    %166 = vector.multi_reduction <add>, %165, %cst_78 [0] : vector<16x16xf32> to vector<16xf32>
    %167 = vector.shape_cast %166 : vector<16xf32> to vector<1x16xf32>
    %168 = tpu.reciprocal %167 {approx = true} : vector<1x16xf32> -> vector<1x16xf32>
    %169 = vector.broadcast %168 : vector<1x16xf32> to vector<16x16xf32>
    %170 = arith.mulf %165, %169 : vector<16x16xf32>
    %cst_79 = arith.constant dense<0.000000e+00> : vector<16x16xf32>
    %171 = tpu.matmul %170, %145, %cst_79 {dimension_numbers = #tpu.dot_dimension_numbers<[0], [0], [1], [1], [0, 1, 1, 1], [], []>} : vector<16x16xf32>, vector<16x16xf32>, vector<16x16xf32> -> vector<16x16xf32>
    %c0_80 = arith.constant 0 : index
    %c32 = arith.constant 32 : index
    %172 = vector.load %arg36[%c0_80, %c32] : memref<16x64xf32, #tpu.memory_space<vmem>>, vector<16x16xf32>
    tpu.vector_store %arg36[%c0_80, %c32], %171 {strides = array<i32>} : memref<16x64xf32, #tpu.memory_space<vmem>>, vector<16x16xf32>,
    %173 = vector.extract_strided_slice %84 {offsets = [0, 48], sizes = [16, 16], strides = [1, 1]} : vector<16x64xf32> to vector<16x16xf32>
    %174 = vector.extract_strided_slice %86 {offsets = [0, 3], sizes = [16, 1], strides = [1, 1]} : vector<16x4xf32> to vector<16x1xf32>
    %175 = vector.extract_strided_slice %88 {offsets = [3, 0], sizes = [1, 16], strides = [1, 1]} : vector<4x16xf32> to vector<1x16xf32>
    %176 = vector.broadcast %174 : vector<16x1xf32> to vector<16x16xf32>
    %177 = vector.broadcast %175 : vector<1x16xf32> to vector<16x16xf32>
    %178 = arith.addf %176, %177 : vector<16x16xf32>
    %cst_81 = arith.constant 0.000000e+00 : f32
    %179 = vector.broadcast %cst_81 : f32 to vector<16x16xf32>
    %180 = arith.cmpf ogt, %178, %179 : vector<16x16xf32>
    %cst_82 = arith.constant 2.000000e-01 : f32
    %181 = vector.broadcast %cst_82 : f32 to vector<16x16xf32>
    %182 = arith.mulf %181, %178 : vector<16x16xf32>
    %183 = arith.select %180, %178, %182 : vector<16x16xi1>, vector<16x16xf32>
    %cst_83 = arith.constant 0.000000e+00 : f32
    %184 = vector.broadcast %cst_83 : f32 to vector<16x16xf32>
    %185 = arith.cmpf ogt, %77, %184 : vector<16x16xf32>
    %cst_84 = arith.constant -1.000000e+30 : f32
    %186 = vector.broadcast %cst_84 : f32 to vector<16x16xf32>
    %187 = arith.select %185, %183, %186 : vector<16x16xi1>, vector<16x16xf32>
    %cst_85 = arith.constant dense<0xFF800000> : vector<16xf32>
    %188 = vector.multi_reduction <maximumf>, %187, %cst_85 [0] : vector<16x16xf32> to vector<16xf32>
    %189 = vector.shape_cast %188 : vector<16xf32> to vector<1x16xf32>
    %190 = vector.broadcast %189 : vector<1x16xf32> to vector<16x16xf32>
    %191 = arith.subf %187, %190 : vector<16x16xf32>
    %192 = math.exp %191 : vector<16x16xf32>
    %193 = arith.mulf %192, %81 : vector<16x16xf32>
    %cst_86 = arith.constant dense<0.000000e+00> : vector<16xf32>
    %194 = vector.multi_reduction <add>, %193, %cst_86 [0] : vector<16x16xf32> to vector<16xf32>
    %195 = vector.shape_cast %194 : vector<16xf32> to vector<1x16xf32>
    %196 = tpu.reciprocal %195 {approx = true} : vector<1x16xf32> -> vector<1x16xf32>
    %197 = vector.broadcast %196 : vector<1x16xf32> to vector<16x16xf32>
    %198 = arith.mulf %193, %197 : vector<16x16xf32>
    %cst_87 = arith.constant dense<0.000000e+00> : vector<16x16xf32>
    %199 = tpu.matmul %198, %173, %cst_87 {dimension_numbers = #tpu.dot_dimension_numbers<[0], [0], [1], [1], [0, 1, 1, 1], [], []>} : vector<16x16xf32>, vector<16x16xf32>, vector<16x16xf32> -> vector<16x16xf32>
    %c0_88 = arith.constant 0 : index
    %c48 = arith.constant 48 : index
    %200 = vector.load %arg36[%c0_88, %c48] : memref<16x64xf32, #tpu.memory_space<vmem>>, vector<16x16xf32>
    tpu.vector_store %arg36[%c0_88, %c48], %199 {strides = array<i32>} : memref<16x64xf32, #tpu.memory_space<vmem>>, vector<16x16xf32>,
    %c0_89 = arith.constant 0 : index
    %c0_90 = arith.constant 0 : index
    %201 = vector.load %arg36[%c0_89, %c0_90] : memref<16x64xf32, #tpu.memory_space<vmem>>, vector<16x64xf32>
    %c0_91 = arith.constant 0 : index
    %c0_92 = arith.constant 0 : index
    %202 = vector.load %arg20[%c0_91, %c0_92] : memref<1x64xf32, #tpu.memory_space<vmem>>, vector<1x64xf32>
    %203 = vector.broadcast %202 : vector<1x64xf32> to vector<16x64xf32>
    %204 = arith.addf %201, %203 : vector<16x64xf32>
    %cst_93 = arith.constant 0.000000e+00 : f32
    %205 = vector.broadcast %cst_93 : f32 to vector<16x64xf32>
    %206 = arith.cmpf ogt, %204, %205 : vector<16x64xf32>
    %cst_94 = arith.constant 0.000000e+00 : f32
    %207 = vector.broadcast %cst_94 : f32 to vector<16x64xf32>
    %208 = arith.minimumf %204, %207 : vector<16x64xf32>
    %209 = math.exp %208 : vector<16x64xf32>
    %cst_95 = arith.constant 1.000000e+00 : f32
    %210 = vector.broadcast %cst_95 : f32 to vector<16x64xf32>
    %211 = arith.subf %209, %210 : vector<16x64xf32>
    %212 = arith.select %206, %204, %211 : vector<16x64xi1>, vector<16x64xf32>
    %c0_96 = arith.constant 0 : index
    %c0_97 = arith.constant 0 : index
    %213 = vector.load %arg21[%c0_96, %c0_97] : memref<64x8xf32, #tpu.memory_space<vmem>>, vector<64x8xf32>
    %cst_98 = arith.constant dense<0.000000e+00> : vector<16x8xf32>
    %214 = tpu.matmul %212, %213, %cst_98 {dimension_numbers = #tpu.dot_dimension_numbers<[1], [0], [0], [1], [0, 0, 1, 1], [], []>} : vector<16x64xf32>, vector<64x8xf32>, vector<16x8xf32> -> vector<16x8xf32>
    %c0_99 = arith.constant 0 : index
    %c0_100 = arith.constant 0 : index
    %215 = vector.load %arg22[%c0_99, %c0_100] : memref<8x1xf32, #tpu.memory_space<vmem>>, vector<8x1xf32>
    %cst_101 = arith.constant dense<0.000000e+00> : vector<16x1xf32>
    %216 = tpu.matmul %214, %215, %cst_101 {dimension_numbers = #tpu.dot_dimension_numbers<[1], [0], [0], [1], [0, 0, 1, 1], [], []>} : vector<16x8xf32>, vector<8x1xf32>, vector<16x1xf32> -> vector<16x1xf32>
    %c0_102 = arith.constant 0 : index
    %c0_103 = arith.constant 0 : index
    %217 = vector.load %arg23[%c0_102, %c0_103] : memref<1x8xf32, #tpu.memory_space<vmem>>, vector<1x8xf32>
    %cst_104 = arith.constant dense<0.000000e+00> : vector<1x16xf32>
    %218 = tpu.matmul %217, %214, %cst_104 {dimension_numbers = #tpu.dot_dimension_numbers<[1], [1], [0], [0], [0, 0, 1, 0], [], []>} : vector<1x8xf32>, vector<16x8xf32>, vector<1x16xf32> -> vector<1x16xf32>
    %219 = vector.broadcast %216 : vector<16x1xf32> to vector<16x16xf32>
    %220 = vector.broadcast %218 : vector<1x16xf32> to vector<16x16xf32>
    %221 = arith.addf %219, %220 : vector<16x16xf32>
    %cst_105 = arith.constant 0.000000e+00 : f32
    %222 = vector.broadcast %cst_105 : f32 to vector<16x16xf32>
    %223 = arith.cmpf ogt, %221, %222 : vector<16x16xf32>
    %cst_106 = arith.constant 2.000000e-01 : f32
    %224 = vector.broadcast %cst_106 : f32 to vector<16x16xf32>
    %225 = arith.mulf %224, %221 : vector<16x16xf32>
    %226 = arith.select %223, %221, %225 : vector<16x16xi1>, vector<16x16xf32>
    %cst_107 = arith.constant 0.000000e+00 : f32
    %227 = vector.broadcast %cst_107 : f32 to vector<16x16xf32>
    %228 = arith.cmpf ogt, %77, %227 : vector<16x16xf32>
    %cst_108 = arith.constant -1.000000e+30 : f32
    %229 = vector.broadcast %cst_108 : f32 to vector<16x16xf32>
    %230 = arith.select %228, %226, %229 : vector<16x16xi1>, vector<16x16xf32>
    %cst_109 = arith.constant dense<0xFF800000> : vector<16xf32>
    %231 = vector.multi_reduction <maximumf>, %230, %cst_109 [0] : vector<16x16xf32> to vector<16xf32>
    %232 = vector.shape_cast %231 : vector<16xf32> to vector<1x16xf32>
    %233 = vector.broadcast %232 : vector<1x16xf32> to vector<16x16xf32>
    %234 = arith.subf %230, %233 : vector<16x16xf32>
    %235 = math.exp %234 : vector<16x16xf32>
    %236 = arith.mulf %235, %81 : vector<16x16xf32>
    %cst_110 = arith.constant dense<0.000000e+00> : vector<16xf32>
    %237 = vector.multi_reduction <add>, %236, %cst_110 [0] : vector<16x16xf32> to vector<16xf32>
    %238 = vector.shape_cast %237 : vector<16xf32> to vector<1x16xf32>
    %239 = tpu.reciprocal %238 {approx = true} : vector<1x16xf32> -> vector<1x16xf32>
    %240 = vector.broadcast %239 : vector<1x16xf32> to vector<16x16xf32>
    %241 = arith.mulf %236, %240 : vector<16x16xf32>
    %cst_111 = arith.constant dense<0.000000e+00> : vector<16x8xf32>
    %242 = tpu.matmul %241, %214, %cst_111 {dimension_numbers = #tpu.dot_dimension_numbers<[0], [0], [1], [1], [0, 1, 1, 1], [], []>} : vector<16x16xf32>, vector<16x8xf32>, vector<16x8xf32> -> vector<16x8xf32>
    %c0_112 = arith.constant 0 : index
    %c0_113 = arith.constant 0 : index
    %243 = vector.load %arg24[%c0_112, %c0_113] : memref<1x8xf32, #tpu.memory_space<vmem>>, vector<1x8xf32>
    %244 = vector.broadcast %243 : vector<1x8xf32> to vector<16x8xf32>
    %245 = arith.addf %242, %244 : vector<16x8xf32>
    %246 = tpu.iota {dimensions = array<i32: 1>} : vector<1x16xi32>
    %247 = vector.broadcast %3 : vector<8x1xi32> to vector<8x16xi32>
    %248 = vector.broadcast %246 : vector<1x16xi32> to vector<8x16xi32>
    %249 = arith.cmpi eq, %247, %248 : vector<8x16xi32>
    %250 = arith.extui %249 : vector<8x16xi1> to vector<8x16xi32>
    %251 = arith.sitofp %250 : vector<8x16xi32> to vector<8x16xf32>
    %cst_114 = arith.constant dense<0.000000e+00> : vector<8x8xf32>
    %252 = tpu.matmul %251, %245, %cst_114 {dimension_numbers = #tpu.dot_dimension_numbers<[1], [0], [0], [1], [0, 0, 1, 1], [], []>} : vector<8x16xf32>, vector<16x8xf32>, vector<8x8xf32> -> vector<8x8xf32>
    %c0_115 = arith.constant 0 : index
    %c0_116 = arith.constant 0 : index
    %253 = vector.load %arg25[%c0_115, %c0_116] : memref<8x1xf32, #tpu.memory_space<vmem>>, vector<8x1xf32>
    %cst_117 = arith.constant dense<0.000000e+00> : vector<8x1xf32>
    %254 = tpu.matmul %8, %253, %cst_117 {dimension_numbers = #tpu.dot_dimension_numbers<[1], [0], [0], [1], [0, 0, 1, 1], [], []>} : vector<8x8xf32>, vector<8x1xf32>, vector<8x1xf32> -> vector<8x1xf32>
    %c0_118 = arith.constant 0 : index
    %c0_119 = arith.constant 0 : index
    %255 = vector.load %arg26[%c0_118, %c0_119] : memref<1x1xf32, #tpu.memory_space<vmem>>, vector<1x1xf32>
    %256 = vector.broadcast %255 : vector<1x1xf32> to vector<8x1xf32>
    %257 = arith.addf %254, %256 : vector<8x1xf32>
    %cst_120 = arith.constant 0.000000e+00 : f32
    %258 = vector.broadcast %cst_120 : f32 to vector<8x1xf32>
    %259 = arith.subf %258, %257 : vector<8x1xf32>
    %260 = math.exp %259 : vector<8x1xf32>
    %cst_121 = arith.constant 1.000000e+00 : f32
    %261 = vector.broadcast %cst_121 : f32 to vector<8x1xf32>
    %262 = arith.addf %261, %260 : vector<8x1xf32>
    %263 = tpu.reciprocal %262 {approx = true} : vector<8x1xf32> -> vector<8x1xf32>
    %c0_122 = arith.constant 0 : index
    %c0_123 = arith.constant 0 : index
    %264 = vector.load %arg27[%c0_122, %c0_123] : memref<8x1xf32, #tpu.memory_space<vmem>>, vector<8x1xf32>
    %cst_124 = arith.constant dense<0.000000e+00> : vector<8x1xf32>
    %265 = tpu.matmul %76, %264, %cst_124 {dimension_numbers = #tpu.dot_dimension_numbers<[1], [0], [0], [1], [0, 0, 1, 1], [], []>} : vector<8x8xf32>, vector<8x1xf32>, vector<8x1xf32> -> vector<8x1xf32>
    %c0_125 = arith.constant 0 : index
    %c0_126 = arith.constant 0 : index
    %266 = vector.load %arg28[%c0_125, %c0_126] : memref<1x1xf32, #tpu.memory_space<vmem>>, vector<1x1xf32>
    %267 = vector.broadcast %266 : vector<1x1xf32> to vector<8x1xf32>
    %268 = arith.addf %265, %267 : vector<8x1xf32>
    %cst_127 = arith.constant 0.000000e+00 : f32
    %269 = vector.broadcast %cst_127 : f32 to vector<8x1xf32>
    %270 = arith.subf %269, %268 : vector<8x1xf32>
    %271 = math.exp %270 : vector<8x1xf32>
    %cst_128 = arith.constant 1.000000e+00 : f32
    %272 = vector.broadcast %cst_128 : f32 to vector<8x1xf32>
    %273 = arith.addf %272, %271 : vector<8x1xf32>
    %274 = tpu.reciprocal %273 {approx = true} : vector<8x1xf32> -> vector<8x1xf32>
    %c0_129 = arith.constant 0 : index
    %c0_130 = arith.constant 0 : index
    %275 = vector.load %arg29[%c0_129, %c0_130] : memref<8x1xf32, #tpu.memory_space<vmem>>, vector<8x1xf32>
    %cst_131 = arith.constant dense<0.000000e+00> : vector<8x1xf32>
    %276 = tpu.matmul %252, %275, %cst_131 {dimension_numbers = #tpu.dot_dimension_numbers<[1], [0], [0], [1], [0, 0, 1, 1], [], []>} : vector<8x8xf32>, vector<8x1xf32>, vector<8x1xf32> -> vector<8x1xf32>
    %c0_132 = arith.constant 0 : index
    %c0_133 = arith.constant 0 : index
    %277 = vector.load %arg30[%c0_132, %c0_133] : memref<1x1xf32, #tpu.memory_space<vmem>>, vector<1x1xf32>
    %278 = vector.broadcast %277 : vector<1x1xf32> to vector<8x1xf32>
    %279 = arith.addf %276, %278 : vector<8x1xf32>
    %cst_134 = arith.constant 0.000000e+00 : f32
    %280 = vector.broadcast %cst_134 : f32 to vector<8x1xf32>
    %281 = arith.subf %280, %279 : vector<8x1xf32>
    %282 = math.exp %281 : vector<8x1xf32>
    %cst_135 = arith.constant 1.000000e+00 : f32
    %283 = vector.broadcast %cst_135 : f32 to vector<8x1xf32>
    %284 = arith.addf %283, %282 : vector<8x1xf32>
    %285 = tpu.reciprocal %284 {approx = true} : vector<8x1xf32> -> vector<8x1xf32>
    %286 = arith.addf %263, %274 : vector<8x1xf32>
    %287 = arith.addf %286, %285 : vector<8x1xf32>
    %288 = tpu.reciprocal %287 {approx = true} : vector<8x1xf32> -> vector<8x1xf32>
    %289 = arith.mulf %263, %288 : vector<8x1xf32>
    %290 = vector.broadcast %289 : vector<8x1xf32> to vector<8x8xf32>
    %291 = arith.mulf %290, %8 : vector<8x8xf32>
    %c0_136 = arith.constant 0 : index
    %c0_137 = arith.constant 0 : index
    %292 = vector.load %arg31[%c0_136, %c0_137] : memref<8x1xf32, #tpu.memory_space<vmem>>, vector<8x1xf32>
    %cst_138 = arith.constant dense<0.000000e+00> : vector<8x1xf32>
    %293 = tpu.matmul %291, %292, %cst_138 {dimension_numbers = #tpu.dot_dimension_numbers<[1], [0], [0], [1], [0, 0, 1, 1], [], []>} : vector<8x8xf32>, vector<8x1xf32>, vector<8x1xf32> -> vector<8x1xf32>
    %294 = arith.mulf %274, %288 : vector<8x1xf32>
    %295 = vector.broadcast %294 : vector<8x1xf32> to vector<8x8xf32>
    %296 = arith.mulf %295, %76 : vector<8x8xf32>
    %c0_139 = arith.constant 0 : index
    %c0_140 = arith.constant 0 : index
    %297 = vector.load %arg32[%c0_139, %c0_140] : memref<8x1xf32, #tpu.memory_space<vmem>>, vector<8x1xf32>
    %cst_141 = arith.constant dense<0.000000e+00> : vector<8x1xf32>
    %298 = tpu.matmul %296, %297, %cst_141 {dimension_numbers = #tpu.dot_dimension_numbers<[1], [0], [0], [1], [0, 0, 1, 1], [], []>} : vector<8x8xf32>, vector<8x1xf32>, vector<8x1xf32> -> vector<8x1xf32>
    %299 = arith.addf %293, %298 : vector<8x1xf32>
    %300 = arith.mulf %285, %288 : vector<8x1xf32>
    %301 = vector.broadcast %300 : vector<8x1xf32> to vector<8x8xf32>
    %302 = arith.mulf %301, %252 : vector<8x8xf32>
    %c0_142 = arith.constant 0 : index
    %c0_143 = arith.constant 0 : index
    %303 = vector.load %arg33[%c0_142, %c0_143] : memref<8x1xf32, #tpu.memory_space<vmem>>, vector<8x1xf32>
    %cst_144 = arith.constant dense<0.000000e+00> : vector<8x1xf32>
    %304 = tpu.matmul %302, %303, %cst_144 {dimension_numbers = #tpu.dot_dimension_numbers<[1], [0], [0], [1], [0, 0, 1, 1], [], []>} : vector<8x8xf32>, vector<8x1xf32>, vector<8x1xf32> -> vector<8x1xf32>
    %305 = arith.addf %299, %304 : vector<8x1xf32>
    %c0_145 = arith.constant 0 : index
    %c0_146 = arith.constant 0 : index
    %306 = vector.load %arg34[%c0_145, %c0_146] : memref<1x1xf32, #tpu.memory_space<vmem>>, vector<1x1xf32>
    %307 = vector.broadcast %306 : vector<1x1xf32> to vector<8x1xf32>
    %308 = arith.addf %305, %307 : vector<8x1xf32>
    %cst_147 = arith.constant dense<0xFF800000> : vector<8xf32>
    %309 = vector.multi_reduction <maximumf>, %308, %cst_147 [1] : vector<8x1xf32> to vector<8xf32>
    %310 = vector.shape_cast %309 : vector<8xf32> to vector<8x1xf32>
    %311 = arith.subf %308, %310 : vector<8x1xf32>
    %312 = math.exp %311 : vector<8x1xf32>
    %cst_148 = arith.constant dense<0.000000e+00> : vector<8xf32>
    %313 = vector.multi_reduction <add>, %312, %cst_148 [1] : vector<8x1xf32> to vector<8xf32>
    %314 = vector.shape_cast %313 : vector<8xf32> to vector<8x1xf32>
    %315 = tpu.reciprocal %314 {approx = true} : vector<8x1xf32> -> vector<8x1xf32>
    %316 = arith.mulf %312, %315 : vector<8x1xf32>
    %c0_149 = arith.constant 0 : index
    %c0_150 = arith.constant 0 : index
    %317 = vector.load %arg35[%c0_149, %c0_150] : memref<8x1xf32, #tpu.memory_space<vmem>>, vector<8x1xf32>
    tpu.vector_store %arg35[%c0_149, %c0_150], %316 {strides = array<i32>} : memref<8x1xf32, #tpu.memory_space<vmem>>, vector<8x1xf32>,
    return
  }
}

</mosaic_0001>

<bundles_post_ra>
// kernel: tpu_custom_call.1
= control target key start
LH: loop header
LB: loop body
LE: loop exit
PB: predicated region body
PF: predicated region fallthrough
CT: control target
= control target key end

     0   :  { %v3703_v0 = vmov 0   ;;  %s3704_s3 = smov 1   ;;  %v3705_v1 = vmov 0.0   ;;  %s3706_s7 = smov 3   ;;  %vm3707_vm0 = vmmov 0   ;;  %vm260_vm1 = vcmask 1041408   ;;  %s4158_s0 = inlined_call_operand.smem [shape: u32[36], index: -1, kind: input, shape index: {}] }
   0x1   :  { %3635 = vset.pattern.permute.xlu0 %v3703_v0  ;;  %s3151_s6 = sld [smem:[%s4158_s0 + %s3704_s3]]   ;;  %3367 = vmatprep.subr.mxu1 %v3705_v1  ;;  %s3708_s11 = smov 7   ;;  %v3711_v5 = vmov 1   ;;  %vm166_vm2 = vcmask 130048   ;;  %v246_v10 = vlaneseq  ;;  %vm256_vm3 = vcmask 80896  }
   0x2   :  { %s3153_s10 = sld [smem:[%s4158_s0 + %s3706_s7]]   ;;  %3360 = vmatprep.subr.mxu0 %v3705_v1  ;;  %3371 = vmatprep.mubr.msk.f32.mxu1 %vm3707_vm0, %v3705_v1  ;;  %s3709_s15 = smov 2   ;;  %v3712_v16 = vmov 2   ;;  %vm334_vm5 = vcmask 64512   ;;  %vm491_vm6 = vcmask 1043456   ;;  %vm487_vm8 = vcmask 162816  }
   0x3   :  { %3364 = vmatprep.mubr.msk.f32.mxu0 %vm3707_vm0, %v3705_v1  ;;  %s3157_s14 = sld [smem:[%s4158_s0 + %s3708_s11]]   ;;  %s3710_s19 = smov 9   ;;  %v3793_v11 = vand.u32 127, %v246_v10  ;;  %3637 = vset.pattern.permute.xlu1 %v3712_v16  ;;  %v3714_v29 = vmov 3   ;;  %vm653_vm9 = vcmask 1045504   ;;  %vm649_vm11 = vcmask 244736  }
   0x4   :  { %s3152_s18 = sld [smem:[%s4158_s0 + %s3709_s15]]   ;;  %s3713_s23 = smov 4   ;;  %vm812_vm13 = vcmask 326656   ;;  %vm980_vm14 = vcmask 261120   ;;  %vm1239_vm15 = vcmask 523264  }
   0x5   :  { %s3778_s22 = sld [smem:[%s4158_s0 + %s3710_s19]]   ;;  %s3715_s27 = smov 5  }
   0x6   :  { %s3154_s26 = sld [smem:[%s4158_s0 + %s3713_s23]]   ;;  %s3716_s1 = smov 6  }
   0x7   :  { %v3766_v2 = vld [vmem:[%s3151_s6] sm:$0xff]  ;;  %s3155_s30 = sld [smem:[%s4158_s0 + %s3715_s27]]   ;;  %s3717_s5 = smov 11  }
   0x8   :  { %249 = vperm.xlu0 %3635, %v3766_v2   ;;  %v255_v3 = vld [vmem:[%s3153_s10 + $0x8] sm:$0x3]  ;;  %v254_v4 = vld [vmem:[%s3153_s10] sm:$0xff]  ;;  %640 = vperm.xlu1 %3637, %v3766_v2   ;;  %s3156_s4 = sld [smem:[%s4158_s0 + %s3716_s1]]   ;;  %s3718_s9 = smov 17  }
   0x9   :  { %3368 = vmatpush3.msk.msra.mxu1 %vm260_vm1, %v255_v3  ;;  %v158_v6 = vld [vmem:[%s3157_s14 + $0x8] sm:$0xff]  ;;  %v157_v7 = vld [vmem:[%s3157_s14] sm:$0xff]  ;;  %s3161_s8 = sld [smem:[%s4158_s0 + %s3717_s5]]   ;;  %s3719_s13 = smov 13  }
   0xa   :  { %3369 = vmatprep.subr.mxu1 %v3705_v1  ;;  %3361 = vmatpush3.msra.mxu0 %v158_v6  ;;  %v154_v8 = vld [vmem:[%s3152_s18] sm:$0xff]  ;;  %s3167_s12 = sld [smem:[%s4158_s0 + %s3718_s9]]   ;;  %s3720_s17 = smov 10  }
   0xb   :  { %3370 = vmatpush3.msra.mxu1 %v254_v4  ;;  %3362 = vmatprep.subr.mxu0 %v3705_v1  ;;  %v240_v9 = vld [vmem:[%s3778_s22] sm:$0xff]  ;;  %v245_v13 = vld [vmem:[%s3778_s22 + $0x28] sm:$0xff]  ;;  %v242_v40 = vld [vmem:[%s3778_s22 + $0x10] sm:$0xff]  ;;  %s3876_s16 = sld [smem:[%s4158_s0 + %s3719_s13]]   ;;  %s3721_s21 = smov 15  }
   0xc   :  { %3636 = vset.pattern.permute.xlu0 %v3711_v5  ;;  %3379 = vmatprep.subr.mxu1 %v3705_v1  ;;  %v244_v15 = vld [vmem:[%s3778_s22 + $0x20] sm:$0xff]  ;;  %v486_v20 = vld [vmem:[%s3154_s26 + $0x10] sm:$0xf]  ;;  %v485_v22 = vld [vmem:[%s3154_s26 + $0x8] sm:$0xff]  ;;  %s3160_s20 = sld [smem:[%s4158_s0 + %s3720_s17]]   ;;  %s3722_s25 = smov 18  }
   0xd   :  { %479 = vperm.xlu0 %3636, %v3766_v2   ;;  %3363 = vmatpush3.msra.mxu0 %v157_v7  ;;  %v484_v24 = vld [vmem:[%s3154_s26] sm:$0xff]  ;;  %v241_v27 = vld [vmem:[%s3778_s22 + $0x8] sm:$0xff]  ;;  %v648_v32 = vld [vmem:[%s3155_s30 + $0x18] sm:$0x3f]  ;;  %s3165_s24 = sld [smem:[%s4158_s0 + %s3721_s21]]   ;;  %s3723_s29 = smov 12  }
   0xe   :  { %3365 = vmatmul.mubr.msk.f32.vlgmr.msra.gmra.mxu0 %vm166_vm2, %v154_v8  ;;  %3374 = vmatprep.subr.mxu0 %v3705_v1  ;;  %v647_v35 = vld [vmem:[%s3155_s30 + $0x10] sm:$0xff]  ;;  %v646_v37 = vld [vmem:[%s3155_s30 + $0x8] sm:$0xff]  ;;  %v645_v38 = vld [vmem:[%s3155_s30] sm:$0xff]  ;;  %s3897_s28 = sld [smem:[%s4158_s0 + %s3722_s25]]   ;;  %s3724_s3 = smov 19  }
   0xf   :  { %3375 = vmatpush3.msra.mxu0 %v240_v9  ;;  %3376 = vmatprep.mubr.msk.f32.mxu0 %vm3707_vm0, %v3705_v1  ;;  %v811_v45 = vld [vmem:[%s3156_s4 + $0x20] sm:$0xff]  ;;  %v810_v47 = vld [vmem:[%s3156_s4 + $0x18] sm:$0xff]  ;;  %v809_v50 = vld [vmem:[%s3156_s4 + $0x10] sm:$0xff]  ;;  %s3162_s2 = sld [smem:[%s4158_s0 + %s3723_s29]]   ;;  %s3725_s7 = smov 96  }
  0x10   :  { %3386 = vmatprep.subr.mxu0 %v3705_v1  ;;  %3638 = vset.pattern.permute.xlu1 %v3714_v29  ;;  %v808_v51 = vld [vmem:[%s3156_s4 + $0x8] sm:$0xff]  ;;  %v807_v52 = vld [vmem:[%s3156_s4] sm:$0xff]  ;;  %v243_v54 = vld [vmem:[%s3778_s22 + $0x18] sm:$0xff]  ;;  %s3169_s6 = sld [smem:[%s4158_s0 + %s3724_s3]]   ;;  %s3727_s9 = smov 80  }
  0x11   :  { %3639 = vset.pattern.permute.xlu0 %v3703_v0  ;;  %802 = vperm.xlu1 %3638, %v3766_v2   ;;  %v972_v60 = vld [vmem:[%s3161_s8 + $0x18] sm:$0xff]  ;;  %v971_v61 = vld [vmem:[%s3161_s8 + $0x10] sm:$0xff]  ;;  %v970_v62 = vld [vmem:[%s3161_s8 + $0x8] sm:$0xff]  ;;  %s3728_s10 = smov 16   ;;  %s3729_s14 = smov 32  }
  0x12   :  { %v969_v63 = vld [vmem:[%s3161_s8] sm:$0xff]  ;;  %v1058_v3 = vld [vmem:[%s3876_s16 + $0x18] sm:$0xff]  ;;  %v1057_v4 = vld [vmem:[%s3876_s16 + $0x10] sm:$0xff]  ;;  %s3726_s8 = smov 112   ;;  %s3166_s13 = sld [smem:[%s4158_s0 + %s3728_s10]]  }
  0x13   :  { %v1149_v2 = vld [vmem:[%s3167_s12] sm:$0xff]  ;;  %s3730_s15 = smov 21   ;;  %s3731_s19 = smov 48  }
  0x14   :  { %v3204_v7 = vld [vmem:[%s3160_s20] ss:$0 sm:$0xff]  ;;  %s3171_s18 = sld [smem:[%s4158_s0 + %s3730_s15]]   ;;  %s3732_s20 = smov 20  }
  0x15   :  { %3640 = vset.pattern.permute.xlu1 %v3711_v5  ;;  %s3170_s23 = sld [smem:[%s4158_s0 + %s3732_s20]]   ;;  %s3735_s5 = smov 25  }
  0x16   :  { %s1_s4 = sld [smem:[%s4158_s0]]   ;;  %s3739_s22 = smov 24  }
  0x17   :  { %s3174_s25 = sld [smem:[%s4158_s0 + %s3739_s22]]   ;;  %s3740_s26 = smov 27  }
  0x18   :  { %s3177_s29 = sld [smem:[%s4158_s0 + %s3740_s26]]   ;;  %s3741_s30 = smov 14  }
  0x19   :  { %s3164_s3 = sld [smem:[%s4158_s0 + %s3741_s30]]   ;;  %s3745_s20 = smov 33  }
  0x1a   :  { %s3182_s15 = sld [smem:[%s4158_s0 + %s3729_s14]]  }
  0x1b   :  { %s3183_s22 = sld [smem:[%s4158_s0 + %s3745_s20]]  }
  0x83   :  { %v250_v12 = vpop.permute.xlu0 %249  ;;  %v641_v34 = vpop.permute.xlu1 %640 }
  0x84   :  { %vm251_vm4 = vcmp.eq.s32.totalorder %v250_v12, %v3793_v11  ;;  %vm642_vm10 = vcmp.eq.s32.totalorder %v641_v34, %v3793_v11  ;;  %v1233_v34 = vld [vmem:[%s3897_s28 + $0x10] sm:$0xff] }
  0x85   :  { %v3188_v14 = vsel %vm251_vm4, 1.0, %v3705_v1  ;;  %v3197_v39 = vsel %vm642_vm10, 1.0, %v3705_v1 }
  0x86   :  { %3372 = vmatmul.mubr.msk.f32.vlgmr.msra.gmra.mxu1 %vm256_vm3, %v3188_v14  ;;  %v1147_v14 = vld [vmem:[%s3165_s24] sm:$0xff] }
  0x87   :  { %3380 = vmatpush3.msra.mxu1 %v245_v13  ;;  %3383 = vmatprep.mubr.msk.f32.mxu1 %vm3707_vm0, %v3705_v1 }
  0x88   :  { %3381 = vmatprep.subr.mxu1 %v3705_v1  ;;  %v480_v19 = vpop.permute.xlu0 %479 }
  0x89   :  { %3382 = vmatpush3.msra.mxu1 %v244_v15  ;;  %vm481_vm7 = vcmp.eq.s32.totalorder %v480_v19, %v3793_v11  ;;  %v1148_v15 = vld [vmem:[%s3165_s24 + $0x8] sm:$0xff]  ;;  %v1055_v19 = vld [vmem:[%s3876_s16] sm:$0xff]  ;;  %s3733_s24 = smov 22  }
  0x8a   :  { %3384 = vmatmul.mubr.msk.f32.vlgmr.msra.gmra.mxu1 %vm166_vm2, %v154_v8  ;;  %3395 = vmatprep.subr.mxu1 %v3705_v1  ;;  %v3193_v25 = vsel %vm481_vm7, 1.0, %v3705_v1  ;;  %s3172_s27 = sld [smem:[%s4158_s0 + %s3733_s24]]  }
  0x8b   :  { %3397 = vmatprep.mubr.msk.f32.mxu1 %vm3707_vm0, %v3705_v1  ;;  %3396 = vmatpush3.msra.mxu1 %v241_v27  ;;  %v1237_v27 = vld [vmem:[%s3897_s28 + $0x30] sm:$0xff] }
  0x8c   :  { %3400 = vmatprep.subr.mxu1 %v3705_v1  ;;  %v803_v49 = vpop.permute.xlu1 %802 }
  0x8d   :  { %vm804_vm12 = vcmp.eq.s32.totalorder %v803_v49, %v3793_v11 }
  0x8e   :  { %v3201_v53 = vsel %vm804_vm12, 1.0, %v3705_v1 }
  0xce   :  { %v3808_v17 = vpop.f32.mrf.mxu0 }
  0xd0   :  { %v3366_v18 = vpop.f32.mrf.mxu0 }
  0xd1   :  { %v1056_v18 = vld [vmem:[%s3876_s16 + $0x8] sm:$0xff]  ;;  %s3744_s16 = smov 31  }
 0x146   :  { %v330_v21 = vpop.f32.mrf.mxu1 }
 0x147   :  { %3377 = vmatmul.mubr.msk.f32.vlgmr.msra.gmra.mxu0 %vm334_vm5, %v330_v21  ;;  %v3205_v21 = vld [vmem:[%s3162_s2] ss:$0 sm:$0xff] }
 0x148   :  { %3387 = vmatpush3.msk.msra.mxu0 %vm491_vm6, %v486_v20  ;;  %v3373_v23 = vpop.f32.mrf.mxu1  ;;  %3392 = vmatprep.mubr.msk.f32.mxu0 %vm3707_vm0, %v3705_v1  ;;  %v1238_v20 = vld [vmem:[%s3897_s28 + $0x38] sm:$0xff] }
 0x149   :  { %3388 = vmatprep.subr.mxu0 %v3705_v1 }
 0x14a   :  { %3389 = vmatpush3.msra.mxu0 %v485_v22  ;;  %v474_v26 = vpop.f32.mrf.mxu1 }
 0x14b   :  { %3390 = vmatprep.subr.mxu0 %v3705_v1 }
 0x14c   :  { %3391 = vmatpush3.msra.mxu0 %v484_v24  ;;  %v3385_v28 = vpop.f32.mrf.mxu1 }
 0x14d   :  { %3393 = vmatmul.mubr.msk.f32.vlgmr.msra.gmra.mxu0 %vm487_vm8, %v3193_v25  ;;  %3411 = vmatprep.subr.mxu0 %v3705_v1  ;;  %v1236_v28 = vld [vmem:[%s3897_s28 + $0x28] sm:$0xff] }
 0x14e   :  { %3413 = vmatprep.mubr.msk.f32.mxu0 %vm3707_vm0, %v3705_v1  ;;  %3412 = vmatpush3.msra.mxu0 %v242_v40 }
 0x14f   :  { %3416 = vmatprep.subr.mxu0 %v3705_v1 }
 0x207   :  { %v404_v30 = vpop.f32.mrf.mxu0 }
 0x208   :  { %v475_v41 = vadd.f32 %v474_v26, %v404_v30 }
 0x209   :  { %v3378_v31 = vpop.f32.mrf.mxu0 }
 0x20a   :  { %v1235_v31 = vld [vmem:[%s3897_s28 + $0x20] sm:$0xff] }
 0x20d   :  { %v561_v33 = vpop.f32.mrf.mxu0 }
 0x20e   :  { %3398 = vmatmul.mubr.msk.f32.vlgmr.msra.gmra.mxu1 %vm334_vm5, %v561_v33  ;;  %v1234_v33 = vld [vmem:[%s3897_s28 + $0x18] sm:$0xff] }
 0x20f   :  { %3401 = vmatpush3.msk.msra.mxu1 %vm653_vm9, %v648_v32  ;;  %v3394_v36 = vpop.f32.mrf.mxu0  ;;  %3408 = vmatprep.mubr.msk.f32.mxu1 %vm3707_vm0, %v3705_v1  ;;  %v1321_v32 = vld [vmem:[%s3169_s6] sm:$0xf] }
 0x210   :  { %3402 = vmatprep.subr.mxu1 %v3705_v1  ;;  %v1231_v36 = vld [vmem:[%s3897_s28] sm:$0xff] }
 0x211   :  { %3403 = vmatpush3.msra.mxu1 %v647_v35  ;;  %v1232_v35 = vld [vmem:[%s3897_s28 + $0x8] sm:$0xff]  ;;  %s3734_s28 = smov 23  }
 0x212   :  { %3404 = vmatprep.subr.mxu1 %v3705_v1  ;;  %s3173_s1 = sld [smem:[%s4158_s0 + %s3734_s28]]  }
 0x213   :  { %3405 = vmatpush3.msra.mxu1 %v646_v37 }
 0x214   :  { %3406 = vmatprep.subr.mxu1 %v3705_v1 }
 0x215   :  { %3407 = vmatpush3.msra.mxu1 %v645_v38 }
 0x216   :  { %3409 = vmatmul.mubr.msk.f32.vlgmr.msra.gmra.mxu1 %vm649_vm11, %v3197_v39  ;;  %3429 = vmatprep.subr.mxu1 %v3705_v1 }
 0x217   :  { %3431 = vmatprep.mubr.msk.f32.mxu1 %vm3707_vm0, %v3705_v1  ;;  %3430 = vmatpush3.msra.mxu1 %v243_v54 }
 0x218   :  { %3434 = vmatprep.subr.mxu1 %v3705_v1 }
 0x2ce   :  { %v634_v42 = vpop.f32.mrf.mxu1 }
 0x2cf   :  { %v638_v43 = vadd.f32 %v634_v42, %v475_v41 }
 0x2d0   :  { %v3399_v44 = vpop.f32.mrf.mxu1 }
 0x2d6   :  { %v723_v46 = vpop.f32.mrf.mxu1 }
 0x2d7   :  { %3414 = vmatmul.mubr.msk.f32.vlgmr.msra.gmra.mxu0 %vm334_vm5, %v723_v46 }
 0x2d8   :  { %3417 = vmatpush3.msra.mxu0 %v811_v45  ;;  %v3410_v48 = vpop.f32.mrf.mxu1  ;;  %3426 = vmatprep.mubr.msk.f32.mxu0 %vm3707_vm0, %v3705_v1 }
 0x2d9   :  { %3418 = vmatprep.subr.mxu0 %v3705_v1 }
 0x2da   :  { %3419 = vmatpush3.msra.mxu0 %v810_v47 }
 0x2db   :  { %3420 = vmatprep.subr.mxu0 %v3705_v1 }
 0x2dc   :  { %3421 = vmatpush3.msra.mxu0 %v809_v50  ;;  %v3943_v50 = vld [vmem:[%s3166_s13] sm:$0xff] }
 0x2dd   :  { %3422 = vmatprep.subr.mxu0 %v3705_v1  ;;  %vm1141_vm3 = vcmp.gt.f32.partialorder %v3943_v50, 0.0 }
 0x2de   :  { %3423 = vmatpush3.msra.mxu0 %v808_v51 }
 0x2df   :  { %3424 = vmatprep.subr.mxu0 %v3705_v1 }
 0x2e0   :  { %3425 = vmatpush3.msra.mxu0 %v807_v52 }
 0x2e1   :  { %3427 = vmatmul.mubr.msk.f32.vlgmr.msra.gmra.mxu0 %vm812_vm13, %v3201_v53  ;;  %3445 = vmatprep.subr.mxu0 %v3705_v1  ;;  %vm1741_vm13 = vcmask 261248  }
 0x2e2   :  { %3453 = vmatprep.mubr.msk.f32.mxu0 %vm3707_vm0, %v3705_v1  ;;  %3446 = vmatpush3.msra.mxu0 %v1058_v3 }
 0x2e3   :  { %3447 = vmatprep.subr.mxu0 %v3705_v1 }
 0x2e4   :  { %3448 = vmatpush3.msra.mxu0 %v1057_v4 }
 0x2e5   :  { %3449 = vmatprep.subr.mxu0 %v3705_v1 }
 0x2e6   :  { %3450 = vmatpush3.msra.mxu0 %v1056_v18 }
 0x2e7   :  { %3451 = vmatprep.subr.mxu0 %v3705_v1 }
 0x2e8   :  { %3452 = vmatpush3.msra.mxu0 %v1055_v19 }
 0x2e9   :  { %3461 = vmatprep.subr.mxu0 %v1238_v20 }
 0x397   :  { %v796_v55 = vpop.f32.mrf.mxu0 }
 0x398   :  { %v800_v56 = vadd.f32 %v796_v55, %v638_v43 }
 0x399   :  { %v3415_v57 = vpop.f32.mrf.mxu0 }
 0x3a1   :  { %v882_v58 = vpop.f32.mrf.mxu0 }
 0x3a2   :  { %3432 = vmatmul.mubr.msk.f32.vlgmr.msra.gmra.mxu1 %vm334_vm5, %v882_v58 }
 0x3a3   :  { %v3428_v59 = vpop.f32.mrf.mxu0  ;;  %3442 = vmatprep.mubr.msk.f32.mxu1 %vm3707_vm0, %v3705_v1  ;;  %3435 = vmatpush3.msra.mxu1 %v972_v60 }
 0x3a4   :  { %3436 = vmatprep.subr.mxu1 %v3705_v1 }
 0x3a5   :  { %3437 = vmatpush3.msra.mxu1 %v971_v61 }
 0x3a6   :  { %3438 = vmatprep.subr.mxu1 %v3705_v1 }
 0x3a7   :  { %3439 = vmatpush3.msra.mxu1 %v970_v62 }
 0x3a8   :  { %3440 = vmatprep.subr.mxu1 %v3705_v1 }
 0x3a9   :  { %3441 = vmatpush3.msra.mxu1 %v969_v63 }
 0x3aa   :  { %3456 = vmatprep.subr.mxu1 %v1149_v2 }
 0x462   :  { %v955_v6 = vpop.f32.mrf.mxu1 }
 0x463   :  { %v959_v8 = vadd.f32 %v955_v6, %v800_v56  ;;  %v3946_v56 = vld [vmem:[%s3166_s13 + $0x8] sm:$0xff]  ;;  %s3737_s13 = smov 26  }
 0x464   :  { %v3433_v9 = vpop.f32.mrf.mxu1  ;;  %vm1142_vm7 = vcmp.gt.f32.partialorder %v3946_v56, 0.0  ;;  %s3176_s17 = sld [smem:[%s4158_s0 + %s3737_s13]]  }
 0x465   :  { %v967_v12 = vadd.f32 %v3204_v7, %v959_v8 }
 0x467   :  { %v968_v13 = vmax.f32 %v967_v12, 0.0 }
 0x469   :  { %3443 = vmatmul.mubr.msk.f32.vlgmr.msra.gmra.mxu1 %vm980_vm14, %v968_v13 }
 0x46a   :  { %3457 = vmatpush3.msra.mxu1 %v1149_v2  ;;  %3458 = vmatprep.mubr.msk.f32.mxu1 %vm334_vm5, %v1147_v14 }
 0x46b   :  { %3480 = vmatprep.subr.mxu1 %v3705_v1 }
 0x46d   :  { %3459 = vmatmul.mubr.msk.f32.vlgmr.msra.gmra.mxu1 %vm334_vm5, %v1148_v15 }
 0x46e   :  { %3484 = vmatprep.mubr.msk.f32.mxu1 %vm3707_vm0, %v3705_v1 }
 0x529   :  { %v1050_v22 = vpop.f32.mrf.mxu1 }
 0x52a   :  { %v1051_v23 = vadd.f32 %v3205_v21, %v1050_v22 }
 0x52b   :  { %v3444_v24 = vpop.f32.mrf.mxu1 }
 0x52c   :  { %v1054_v25 = vmax.f32 %v1051_v23, 0.0 }
 0x52d   :  { %v3460_v26 = vpop.f32.mrf.mxu1 }
 0x52e   :  { %3454 = vmatmul.mubr.msk.f32.vlgmr.msra.gmra.mxu0 %vm980_vm14, %v1054_v25  ;;  %3481 = vmatpush3.xpose.msk.msra.mxu1 %vm1239_vm15, %v3460_v26  ;;  %vm1922_vm14 = vcmask 392448  }
 0x52f   :  { %3462 = vmatpush3.msra.mxu0 %v1238_v20  ;;  %v1222_v30 = vpop.f32.mrf.mxu1  ;;  %3482 = vmatprep.subr.mxu1 %v3705_v1 }
 0x530   :  { %3463 = vmatprep.subr.mxu0 %v1237_v27  ;;  %3477 = vmatprep.mubr.msk.f32.mxu0 %vm1239_vm15, %v1222_v30 }
 0x531   :  { %3464 = vmatpush3.msra.mxu0 %v1237_v27 }
 0x532   :  { %3465 = vmatprep.subr.mxu0 %v1236_v28  ;;  %3483 = vmatpush3.xpose.msk.msra.mxu1 %vm1239_vm15, %v1222_v30 }
 0x533   :  { %3466 = vmatpush3.msra.mxu0 %v1236_v28  ;;  %3487 = vmatprep.subr.mxu1 %v3460_v26 }
 0x534   :  { %3467 = vmatprep.subr.mxu0 %v1235_v31 }
 0x535   :  { %3468 = vmatpush3.msra.mxu0 %v1235_v31  ;;  %3485 = vmatmul.mubr.msk.f32.vlgmr.msra.gmra.mxu1 %vm1239_vm15, %v1321_v32 }
 0x536   :  { %3469 = vmatprep.subr.mxu0 %v1234_v33  ;;  %3488 = vmatpush3.msra.mxu1 %v3460_v26 }
 0x537   :  { %3470 = vmatpush3.msra.mxu0 %v1234_v33  ;;  %3489 = vmatprep.subr.mxu1 %v1222_v30 }
 0x538   :  { %3471 = vmatprep.subr.mxu0 %v1233_v34  ;;  %3490 = vmatpush3.msra.mxu1 %v1222_v30 }
 0x539   :  { %3472 = vmatpush3.msra.mxu0 %v1233_v34 }
 0x53a   :  { %3473 = vmatprep.subr.mxu0 %v1232_v35 }
 0x53b   :  { %3474 = vmatpush3.msra.mxu0 %v1232_v35 }
 0x53c   :  { %3475 = vmatprep.subr.mxu0 %v1231_v36 }
 0x53d   :  { %3476 = vmatpush3.msra.mxu0 %v1231_v36 }
 0x53e   :  { %3478 = vmatmul.mubr.msk.f32.vlgmr.msra.gmra.mxu0 %vm1239_vm15, %v3460_v26 }
 0x5ee   :  { %v3923_v37 = vpop.f32.mrf.mxu0 }
 0x5f0   :  { %v3455_v38 = vpop.f32.mrf.mxu0 }
 0x5f5   :  { %v1391_v39 = vpop.f32.mrf.mxu1 }
 0x5f7   :  { %v3486_v40 = vpop.f32.mrf.mxu1 }
 0x5fe   :  { %v3479_v41 = vpop.f32.mrf.mxu0 }
 0x5ff   :  { %1568 = vperm.xlu1 %3640, %v3479_v41   ;;  %1402 = vperm.xlu0 %3639, %v3479_v41  }
 0x600   :  { %v1312_v42 = vpop.f32.mrf.mxu0 }
 0x603   :  { %3641 = vset.pattern.permute.xlu1 %v3712_v16  ;;  %3644 = vset.pattern.permute.xlu0 %v3712_v16  ;;  %v3932_v16 = vshrl.u32 %v246_v10, 7 }
 0x604   :  { %1749 = vperm.xlu1 %3641, %v3479_v41   ;;  %1745 = vperm.xlu0 %3644, %v1312_v42  }
 0x605   :  { %v1407_v43 = vsub.s32 0, %v3932_v16  ;;  %v1573_v44 = vsub.s32 1, %v3932_v16  ;;  %v1935_v55 = vsub.s32 3, %v3932_v16 }
 0x607   :  { %v1408_v45 = vrot.slane %v1391_v39, %v1407_v43  ;;  %v1574_v10 = vrot.slane %v1391_v39, %v1573_v44  ;;  %v1936_v63 = vrot.slane %v1391_v39, %v1935_v55 }
 0x608   :  { %3642 = vset.pattern.permute.xlu1 %v3703_v0  ;;  %3646 = vset.pattern.permute.xlu0 %v3714_v29 }
 0x609   :  { %1930 = vperm.xlu0 %3646, %v3479_v41   ;;  %1397 = vperm.xlu1 %3642, %v1312_v42  }
 0x60d   :  { %1829 = vrot.lane.b32.xlu0 %v3460_v26, %s3725_s7  ;;  %3643 = vset.pattern.permute.xlu1 %v3711_v5 }
 0x60e   :  { %1564 = vperm.xlu1 %3643, %v1312_v42  }
 0x611   :  { %1827 = vrot.lane.b32.xlu0 %v1222_v30, %s3725_s7 }
 0x612   :  { %3645 = vset.pattern.permute.xlu1 %v3714_v29  ;;  %v1754_v29 = vsub.s32 2, %v3932_v16 }
 0x613   :  { %1926 = vperm.xlu1 %3645, %v1312_v42  }
 0x614   :  { %v1755_v48 = vrot.slane %v1391_v39, %v1754_v29 }
 0x617   :  { %1648 = vrot.lane.b32.xlu1 %v3460_v26, %s3726_s8 }
 0x61b   :  { %1646 = vrot.lane.b32.xlu1 %v1222_v30, %s3726_s8  ;;  %s3175_s8 = sld [smem:[%s4158_s0 + %s3735_s5]]  }
 0x61f   :  { %2010 = vrot.lane.b32.xlu1 %v3460_v26, %s3727_s9 }
 0x623   :  { %2008 = vrot.lane.b32.xlu1 %v1222_v30, %s3727_s9  ;;  %s3736_s9 = smov 8  }
 0x624   :  { %s3158_s12 = sld [smem:[%s4158_s0 + %s3736_s9]]  }
 0x67a   :  { %v1569_v46 = vpop.permute.xlu1 %1568  ;;  %v1403_v47 = vpop.permute.xlu0 %1402 }
 0x67b   :  { %v1410_v49 = vadd.f32 %v1408_v45, %v1403_v47  ;;  %v1576_v57 = vadd.f32 %v1574_v10, %v1569_v46 }
 0x67d   :  { %vm1412_vm1 = vcmp.gt.f32.partialorder %v1410_v49, 0.0  ;;  %v1414_v58 = vmul.f32 0.2, %v1410_v49  ;;  %v1580_v9 = vmul.f32 0.2, %v1576_v57  ;;  %vm1578_vm8 = vcmp.gt.f32.partialorder %v1576_v57, 0.0 }
 0x67f   :  { %v1750_v51 = vpop.permute.xlu1 %1749  ;;  %v1746_v52 = vpop.permute.xlu0 %1745  ;;  %v1416_v4 = vsel %vm1412_vm1, %v1410_v49, %v1414_v58  ;;  %v1582_v23 = vsel %vm1578_vm8, %v1576_v57, %v1580_v9  ;;  %vm2103_vm1 = vcmask 523648  }
 0x680   :  { %v1757_v53 = vadd.f32 %v1755_v48, %v1750_v51  ;;  %v1756_v54 = vadd.f32 %v1755_v48, %v1746_v52  ;;  %v3958_v15 = vsel %vm1142_vm7, %v1416_v4, -1e+30  ;;  %v1584_v34 = vsel %vm1142_vm7, %v1582_v23, -1e+30 }
 0x681   :  { %v1420_v26 = vsel %vm166_vm2, %v3958_v15, -inf  ;;  %v1586_v44 = vsel %vm166_vm2, %v1584_v34, -inf }
 0x682   :  { %vm1759_vm4 = vcmp.gt.f32.partialorder %v1757_v53, 0.0  ;;  %v1761_v59 = vmul.f32 0.2, %v1757_v53  ;;  %vm1758_vm6 = vcmp.gt.f32.partialorder %v1756_v54, 0.0  ;;  %v1760_v60 = vmul.f32 0.2, %v1756_v54 }
 0x684   :  { %v1763_v61 = vsel %vm1759_vm4, %v1757_v53, %v1761_v59  ;;  %v1762_v62 = vsel %vm1758_vm6, %v1756_v54, %v1760_v60  ;;  %v1931_v2 = vpop.permute.xlu0 %1930  ;;  %v1398_v3 = vpop.permute.xlu1 %1397 }
 0x685   :  { %v1765_v6 = vsel %vm1142_vm7, %v1763_v61, -1e+30  ;;  %v1764_v7 = vsel %vm1141_vm3, %v1762_v62, -1e+30  ;;  %v1409_v8 = vadd.f32 %v1408_v45, %v1398_v3  ;;  %v1938_v18 = vadd.f32 %v1936_v63, %v1931_v2 }
 0x686   :  { %v1767_v12 = vsel %vm166_vm2, %v1765_v6, -inf  ;;  %v1766_v13 = vsel %vm166_vm2, %v1764_v7, -inf }
 0x687   :  { %v1768_v14 = vmax.f32 %v1766_v13, %v1767_v12  ;;  %vm1411_vm9 = vcmp.gt.f32.partialorder %v1409_v8, 0.0  ;;  %v1413_v19 = vmul.f32 0.2, %v1409_v8  ;;  %v1942_v30 = vmul.f32 0.2, %v1938_v18 }
 0x688   :  { %v1830_v20 = vpop.permute.xlu0 %1829  ;;  %vm1940_vm11 = vcmp.gt.f32.partialorder %v1938_v18, 0.0 }
 0x689   :  { %v1769_v21 = vrot.slane %v1768_v14, 4  ;;  %3501 = vmatprep.subr.mxu0 %v1830_v20  ;;  %v1565_v22 = vpop.permute.xlu1 %1564  ;;  %v1415_v24 = vsel %vm1411_vm9, %v1409_v8, %v1413_v19  ;;  %v1944_v45 = vsel %vm1940_vm11, %v1938_v18, %v1942_v30 }
 0x68a   :  { %v1575_v25 = vadd.f32 %v1574_v10, %v1565_v22  ;;  %3502 = vmatpush3.msra.mxu0 %v1830_v20  ;;  %v1417_v28 = vsel %vm1141_vm3, %v1415_v24, -1e+30  ;;  %v1946_v55 = vsel %vm1142_vm7, %v1944_v45, -1e+30 }
 0x68b   :  { %v1770_v27 = vmax.f32 %v1768_v14, %v1769_v21  ;;  %v1419_v31 = vsel %vm166_vm2, %v1417_v28, -inf  ;;  %v1948_v8 = vsel %vm166_vm2, %v1946_v55, -inf }
 0x68c   :  { %vm1577_vm10 = vcmp.gt.f32.partialorder %v1575_v25, 0.0  ;;  %v1579_v32 = vmul.f32 0.2, %v1575_v25  ;;  %v1828_v33 = vpop.permute.xlu0 %1827  ;;  %v1421_v36 = vmax.f32 %v1419_v31, %v1420_v26 }
 0x68d   :  { %v1771_v35 = vrot.slane %v1770_v27, 2  ;;  %3503 = vmatprep.subr.mxu0 %v1828_v33 }
 0x68e   :  { %v1581_v38 = vsel %vm1577_vm10, %v1575_v25, %v1579_v32  ;;  %3504 = vmatpush3.msra.mxu0 %v1828_v33  ;;  %v1927_v39 = vpop.permute.xlu1 %1926  ;;  %v1422_v41 = vrot.slane %v1421_v36, 4  ;;  %v3989_v33 = vsel %vm1142_vm7, 1.0, %v3705_v1 }
 0x68f   :  { %v1772_v40 = vmax.f32 %v1770_v27, %v1771_v35  ;;  %v1583_v42 = vsel %vm1141_vm3, %v1581_v38, -1e+30  ;;  %v1937_v29 = vadd.f32 %v1936_v63, %v1927_v39 }
 0x690   :  { %v1585_v46 = vsel %vm166_vm2, %v1583_v42, -inf  ;;  %v1423_v48 = vmax.f32 %v1421_v36, %v1422_v41 }
 0x691   :  { %v1773_v47 = vrot.slane %v1772_v40, 1  ;;  %v1587_v10 = vmax.f32 %v1585_v46, %v1586_v44  ;;  %vm1939_vm12 = vcmp.gt.f32.partialorder %v1937_v29, 0.0  ;;  %v1941_v49 = vmul.f32 0.2, %v1937_v29 }
 0x692   :  { %v3971_v51 = vpop.permute.xlu1 %1648  ;;  %v1424_v53 = vrot.slane %v1423_v48, 2 }
 0x693   :  { %v1774_v52 = vmax.f32 %v1772_v40, %v1773_v47  ;;  %v1588_v54 = vrot.slane %v1587_v10, 4  ;;  %3494 = vmatprep.subr.mxu1 %v3971_v51  ;;  %v1943_v57 = vsel %vm1939_vm12, %v1937_v29, %v1941_v49 }
 0x694   :  { %v1425_v60 = vmax.f32 %v1423_v48, %v1424_v53  ;;  %v1945_v62 = vsel %vm1141_vm3, %v1943_v57, -1e+30 }
 0x695   :  { %v1775_v58 = vsub.f32 %v1764_v7, %v1774_v52  ;;  %v1776_v59 = vsub.f32 %v1765_v6, %v1774_v52  ;;  %v1589_v61 = vmax.f32 %v1587_v10, %v1588_v54  ;;  %v1947_v9 = vsel %vm166_vm2, %v1945_v62, -inf }
 0x696   :  { %v1426_v3 = vrot.slane %v1425_v60, 1  ;;  %v1949_v14 = vmax.f32 %v1947_v9, %v1948_v8 }
 0x697   :  { %v1777_v63 = vmul.f32 1.442695, %v1775_v58  ;;  %v1779_v2 = vmul.f32 1.442695, %v1776_v59  ;;  %v1590_v4 = vrot.slane %v1589_v61, 2 }
 0x698   :  { %v1427_v12 = vmax.f32 %v1425_v60, %v1426_v3  ;;  %v1950_v19 = vrot.slane %v1949_v14, 4 }
 0x699   :  { %3651 = vpow2.f32 %v1777_v63  ;;  %v1591_v13 = vmax.f32 %v1589_v61, %v1590_v4 }
 0x69a   :  { %3653 = vpow2.f32 %v1779_v2  ;;  %v1428_v7 = vsub.f32 %v1417_v28, %v1427_v12  ;;  %v1429_v6 = vsub.f32 %v3958_v15, %v1427_v12  ;;  %v1951_v23 = vmax.f32 %v1949_v14, %v1950_v19 }
 0x69b   :  { %v1592_v18 = vrot.slane %v1591_v13, 1  ;;  %v3984_v15 = vsel %vm1141_vm3, 1.0, %v3705_v1 }
 0x69c   :  { %v1430_v20 = vmul.f32 1.442695, %v1428_v7  ;;  %v1432_v21 = vmul.f32 1.442695, %v1429_v6  ;;  %v1952_v26 = vrot.slane %v1951_v23, 2 }
 0x69d   :  { %v1593_v22 = vmax.f32 %v1591_v13, %v1592_v18 }
 0x69e   :  { %3655 = vpow2.f32 %v1430_v20  ;;  %v1953_v31 = vmax.f32 %v1951_v23, %v1952_v26 }
 0x69f   :  { %v1594_v24 = vsub.f32 %v1583_v42, %v1593_v22  ;;  %v1595_v25 = vsub.f32 %v1584_v34, %v1593_v22  ;;  %3657 = vpow2.f32 %v1432_v21 }
 0x6a0   :  { %v1954_v32 = vrot.slane %v1953_v31, 1 }
 0x6a1   :  { %v1596_v27 = vmul.f32 1.442695, %v1594_v24  ;;  %v1598_v30 = vmul.f32 1.442695, %v1595_v25 }
 0x6a2   :  { %v1955_v28 = vmax.f32 %v1953_v31, %v1954_v32 }
 0x6a3   :  { %3659 = vpow2.f32 %v1596_v27 }
 0x6a4   :  { %3661 = vpow2.f32 %v1598_v30  ;;  %v1956_v36 = vsub.f32 %v1945_v62, %v1955_v28  ;;  %v1957_v38 = vsub.f32 %v1946_v55, %v1955_v28 }
 0x6a6   :  { %v3652_v34 = vpop.eup %3651  ;;  %v1958_v41 = vmul.f32 1.442695, %v1956_v36  ;;  %v1960_v42 = vmul.f32 1.442695, %v1957_v38 }
 0x6a7   :  { %v3654_v35 = vpop.eup %3653  ;;  %v3992_v39 = vmul.f32 %v3652_v34, %v3984_v15 }
 0x6a8   :  { %v3995_v40 = vmul.f32 %v3654_v35, %v3989_v33  ;;  %3663 = vpow2.f32 %v1958_v41 }
 0x6a9   :  { %v1783_v29 = vsel %vm166_vm2, %v3992_v39, 0.0  ;;  %3665 = vpow2.f32 %v1960_v42 }
 0x6aa   :  { %v1784_v44 = vsel %vm166_vm2, %v3995_v40, 0.0 }
 0x6ab   :  { %v1785_v45 = vadd.f32 %v1784_v44, %v1783_v29  ;;  %v3656_v46 = vpop.eup %3655 }
 0x6ac   :  { %v3658_v47 = vpop.eup %3657  ;;  %v1434_v48 = vmul.f32 %v3656_v46, %v3984_v15 }
 0x6ad   :  { %v1786_v10 = vrot.slane %v1785_v45, 4  ;;  %v1435_v49 = vmul.f32 %v3658_v47, %v3989_v33 }
 0x6ae   :  { %v1436_v52 = vsel %vm166_vm2, %v1434_v48, 0.0 }
 0x6af   :  { %v1437_v54 = vsel %vm166_vm2, %v1435_v49, 0.0  ;;  %v1787_v59 = vadd.f32 %v1786_v10, %v1785_v45 }
 0x6b0   :  { %v3660_v53 = vpop.eup %3659  ;;  %v1438_v57 = vadd.f32 %v1437_v54, %v1436_v52 }
 0x6b1   :  { %v3662_v55 = vpop.eup %3661  ;;  %v1600_v58 = vmul.f32 %v3660_v53, %v3984_v15  ;;  %v1788_v4 = vrot.slane %v1787_v59, 2 }
 0x6b2   :  { %v1601_v60 = vmul.f32 %v3662_v55, %v3989_v33  ;;  %v1439_v61 = vrot.slane %v1438_v57, 4 }
 0x6b3   :  { %v1602_v62 = vsel %vm166_vm2, %v1600_v58, 0.0  ;;  %v1789_v6 = vadd.f32 %v1788_v4, %v1787_v59 }
 0x6b4   :  { %v1603_v63 = vsel %vm166_vm2, %v1601_v60, 0.0  ;;  %v1440_v2 = vadd.f32 %v1439_v61, %v1438_v57 }
 0x6b5   :  { %v1604_v3 = vadd.f32 %v1603_v63, %v1602_v62  ;;  %v3664_v12 = vpop.eup %3663  ;;  %v1790_v26 = vrot.slane %v1789_v6, 1 }
 0x6b6   :  { %v1441_v8 = vrot.slane %v1440_v2, 2  ;;  %v3666_v13 = vpop.eup %3665  ;;  %v1962_v18 = vmul.f32 %v3664_v12, %v3984_v15 }
 0x6b7   :  { %v1605_v9 = vrot.slane %v1604_v3, 4  ;;  %v1963_v19 = vmul.f32 %v3666_v13, %v3989_v33  ;;  %v1791_v28 = vadd.f32 %v1790_v26, %v1789_v6 }
 0x6b8   :  { %v1442_v14 = vadd.f32 %v1441_v8, %v1440_v2  ;;  %v1964_v22 = vsel %vm166_vm2, %v1962_v18, 0.0 }
 0x6b9   :  { %v1606_v7 = vadd.f32 %v1605_v9, %v1604_v3  ;;  %v1965_v23 = vsel %vm166_vm2, %v1963_v19, 0.0 }
 0x6ba   :  { %v1443_v20 = vrot.slane %v1442_v14, 1  ;;  %v1966_v27 = vadd.f32 %v1965_v23, %v1964_v22  ;;  %v2130_v22 = vld [vmem:[%s3171_s18 + $0x8] sm:$0xff]  ;;  %v2129_v23 = vld [vmem:[%s3171_s18] sm:$0xff] }
 0x6bb   :  { %v1607_v21 = vrot.slane %v1606_v7, 2 }
 0x6bc   :  { %v1444_v24 = vadd.f32 %v1443_v20, %v1442_v14  ;;  %v1967_v31 = vrot.slane %v1966_v27, 4  ;;  %v2136_v14 = vld [vmem:[%s3171_s18 + $0x38] sm:$0xff] }
 0x6bd   :  { %v1608_v25 = vadd.f32 %v1607_v21, %v1606_v7  ;;  %v2135_v7 = vld [vmem:[%s3171_s18 + $0x30] sm:$0xff]  ;;  %3515 = vmatprep.subr.mxu0 %v2136_v14  ;;  %v2132_v20 = vld [vmem:[%s3171_s18 + $0x18] sm:$0xff] }
 0x6be   :  { %3667 = vrcp.f32 %v1444_v24  ;;  %v1968_v34 = vadd.f32 %v1967_v31, %v1966_v27  ;;  %v2131_v21 = vld [vmem:[%s3171_s18 + $0x10] sm:$0xff] }
 0x6bf   :  { %v1609_v30 = vrot.slane %v1608_v25, 1 }
 0x6c0   :  { %v1969_v35 = vrot.slane %v1968_v34, 2 }
 0x6c1   :  { %v1610_v32 = vadd.f32 %v1609_v30, %v1608_v25 }
 0x6c2   :  { %v1970_v36 = vadd.f32 %v1969_v35, %v1968_v34 }
 0x6c3   :  { %3669 = vrcp.f32 %v1610_v32  ;;  %v3226_v32 = vld [vmem:[%s3170_s23] ss:$0 sm:$0xff]  ;;  %s3746_s23 = smov 34  }
 0x6c4   :  { %3671 = vrcp.f32 %v1791_v28  ;;  %v1971_v38 = vrot.slane %v1970_v36, 1  ;;  %s3184_s26 = sld [smem:[%s4158_s0 + %s3746_s23]]  }
 0x6c6   :  { %v1972_v41 = vadd.f32 %v1971_v38, %v1970_v36 }
 0x6c8   :  { %3673 = vrcp.f32 %v1972_v41 }
 0x6cb   :  { %v3668_v42 = vpop.eup %3667 }
 0x6cc   :  { %v1446_v29 = vmul.f32 %v3668_v42, %v1434_v48  ;;  %v1447_v45 = vmul.f32 %v3668_v42, %v1435_v49  ;;  %v1647_v49 = vpop.permute.xlu1 %1646 }
 0x6ce   :  { %1448 = vxpose.xlu0.b32.start [1/2] (short) (narrow) %v1446_v29, 16 }
 0x6d0   :  { %v3670_v44 = vpop.eup %3669  ;;  %v2011_v57 = vpop.permute.xlu1 %2010 }
 0x6d1   :  { %v1612_v46 = vmul.f32 %v3670_v44, %v1600_v58  ;;  %v3672_v47 = vpop.eup %3671  ;;  %v1613_v52 = vmul.f32 %v3670_v44, %v1601_v60 }
 0x6d2   :  { %1449 = vxpose.xlu0.b32.end [2/2] (short) (narrow) %v1447_v45, 16  ;;  %v1793_v10 = vmul.f32 %v3672_v47, %v3992_v39  ;;  %v1794_v53 = vmul.f32 %v3672_v47, %v3995_v40 }
 0x6d3   :  { %1614 = vxpose.xlu1.b32.start [1/2] (short) (narrow) %v1612_v46, 16 }
 0x6d4   :  { %v2009_v58 = vpop.permute.xlu1 %2008 }
 0x6d5   :  { %v3674_v54 = vpop.eup %3673 }
 0x6d6   :  { %1795 = vxpose.xlu0.b32.start [1/2] (short) (narrow) %v1793_v10, 16  ;;  %v1974_v55 = vmul.f32 %v3674_v54, %v1962_v18  ;;  %v1975_v48 = vmul.f32 %v3674_v54, %v1963_v19  ;;  %v2134_v18 = vld [vmem:[%s3171_s18 + $0x28] sm:$0xff]  ;;  %v2133_v19 = vld [vmem:[%s3171_s18 + $0x20] sm:$0xff]  ;;  %s3738_s18 = smov 29  }
 0x6d7   :  { %1615 = vxpose.xlu1.b32.end [2/2] (short) (narrow) %v1613_v52, 16  ;;  %s3179_s21 = sld [smem:[%s4158_s0 + %s3738_s18]]  }
 0x6da   :  { %1796 = vxpose.xlu0.b32.end [2/2] (short) (narrow) %v1794_v53, 16  ;;  %v2218_v53 = vld [vmem:[%s3172_s27] sm:$0xff]  ;;  %s3747_s27 = smov 35  }
 0x6db   :  { %s3185_s30 = sld [smem:[%s4158_s0 + %s3747_s27]]  }
 0x6de   :  { %1976 = vxpose.xlu0.b32.start [1/2] (short) (narrow) %v1974_v55, 16 }
 0x6e2   :  { %1977 = vxpose.xlu0.b32.end [2/2] (short) (narrow) %v1975_v48, 16  ;;  %v2300_v48 = vld [vmem:[%s3173_s1] sm:$0x1] }
 0x6f5   :  { %3648 = vset.pattern.permute.xlu1 %v3703_v0 }
 0x70b   :  { %3647 = vset.pattern.permute.xlu0 %v3703_v0 }
 0x74a   :  { %v1464_v59 = vpop.trf.xlu0 }
 0x74b   :  { %3491 = vmatprep.mubr.msk.f32.mxu1 %vm166_vm2, %v1464_v59 }
 0x74e   :  { %v1465_v39 = vpop.trf.xlu0 }
 0x74f   :  { %v1630_v60 = vpop.trf.xlu1  ;;  %3492 = vmatmul.mubr.msk.f32.vlgmr.msra.gmra.mxu1 %vm166_vm2, %v1465_v39 }
 0x750   :  { %3495 = vmatpush3.msra.mxu1 %v3971_v51  ;;  %3498 = vmatprep.mubr.msk.f32.mxu1 %vm166_vm2, %v1630_v60 }
 0x751   :  { %3496 = vmatprep.subr.mxu1 %v1647_v49 }
 0x752   :  { %3497 = vmatpush3.msra.mxu1 %v1647_v49  ;;  %v1811_v40 = vpop.trf.xlu0 }
 0x753   :  { %v1631_v61 = vpop.trf.xlu1  ;;  %3508 = vmatprep.subr.mxu1 %v2011_v57  ;;  %3505 = vmatprep.mubr.msk.f32.mxu0 %vm166_vm2, %v1811_v40 }
 0x754   :  { %3499 = vmatmul.mubr.msk.f32.vlgmr.msra.gmra.mxu1 %vm166_vm2, %v1631_v61 }
 0x755   :  { %3509 = vmatpush3.msra.mxu1 %v2011_v57 }
 0x756   :  { %3510 = vmatprep.subr.mxu1 %v2009_v58  ;;  %v1812_v62 = vpop.trf.xlu0 }
 0x757   :  { %3511 = vmatpush3.msra.mxu1 %v2009_v58  ;;  %3506 = vmatmul.mubr.msk.f32.vlgmr.msra.gmra.mxu0 %vm166_vm2, %v1812_v62 }
 0x758   :  { %3516 = vmatpush3.msra.mxu0 %v2136_v14  ;;  %3534 = vmatprep.subr.mxu1 %v2218_v53 }
 0x759   :  { %3517 = vmatprep.subr.mxu0 %v2135_v7 }
 0x75a   :  { %v1992_v63 = vpop.trf.xlu0  ;;  %3518 = vmatpush3.msra.mxu0 %v2135_v7 }
 0x75b   :  { %3512 = vmatprep.mubr.msk.f32.mxu1 %vm166_vm2, %v1992_v63  ;;  %3519 = vmatprep.subr.mxu0 %v2134_v18 }
 0x75c   :  { %3520 = vmatpush3.msra.mxu0 %v2134_v18 }
 0x75d   :  { %3521 = vmatprep.subr.mxu0 %v2133_v19 }
 0x75e   :  { %v1993_v51 = vpop.trf.xlu0  ;;  %3522 = vmatpush3.msra.mxu0 %v2133_v19 }
 0x75f   :  { %3513 = vmatmul.mubr.msk.f32.vlgmr.msra.gmra.mxu1 %vm166_vm2, %v1993_v51  ;;  %3523 = vmatprep.subr.mxu0 %v2132_v20 }
 0x760   :  { %3524 = vmatpush3.msra.mxu0 %v2132_v20  ;;  %3535 = vmatpush3.msra.mxu1 %v2218_v53 }
 0x761   :  { %3525 = vmatprep.subr.mxu0 %v2131_v21  ;;  %3539 = vmatprep.subr.mxu1 %v3705_v1 }
 0x762   :  { %3526 = vmatpush3.msra.mxu0 %v2131_v21 }
 0x763   :  { %3527 = vmatprep.subr.mxu0 %v2130_v22 }
 0x764   :  { %3528 = vmatpush3.msra.mxu0 %v2130_v22 }
 0x765   :  { %3529 = vmatprep.subr.mxu0 %v2129_v23 }
 0x766   :  { %3530 = vmatpush3.msra.mxu0 %v2129_v23 }
 0x767   :  { %3553 = vmatprep.subr.mxu0 %v3705_v1 }
 0x80f   :  { %v3493_v2 = vpop.f32.mrf.mxu1 }
 0x810   :  { %1562 = vst.msk [vmem:[#allocation2 + $0x8] sm:$0xff] %vm166_vm2, %v3493_v2 }
 0x811   :  { %v1552_v3 = vpop.f32.mrf.mxu1 }
 0x812   :  { %1561 = vst.msk [vmem:[#allocation2] sm:$0xff] %vm166_vm2, %v1552_v3 }
 0x814   :  { %v3500_v4 = vpop.f32.mrf.mxu1 }
 0x815   :  { %1737 = vrot.lane.b32.xlu0 %v3500_v4, %s3728_s10 }
 0x816   :  { %v1724_v12 = vpop.f32.mrf.mxu1 }
 0x817   :  { %v3507_v8 = vpop.f32.mrf.mxu0 }
 0x819   :  { %v1905_v9 = vpop.f32.mrf.mxu0 }
 0x81a   :  { %1916 = vrot.lane.b32.xlu1 %v1905_v9, %s3729_s14 }
 0x81e   :  { %1918 = vrot.lane.b32.xlu1 %v3507_v8, %s3729_s14 }
 0x81f   :  { %v3514_v13 = vpop.f32.mrf.mxu1 }
 0x821   :  { %v2086_v6 = vpop.f32.mrf.mxu1 }
 0x822   :  { %1735 = vrot.lane.b32.xlu1 %v1724_v12, %s3728_s10 }
 0x826   :  { %2097 = vrot.lane.b32.xlu1 %v2086_v6, %s3731_s19 }
 0x82a   :  { %2099 = vrot.lane.b32.xlu1 %v3514_v13, %s3731_s19  ;;  %s3181_s19 = sld [smem:[%s4158_s0 + %s3744_s16]]  }
 0x887   :  { %v1738_v24 = vpop.permute.xlu0 %1737 }
 0x888   :  { %1743 = vst.msk [vmem:[#allocation2 + $0x8] sm:$0xff] %vm1741_vm13, %v1738_v24 }
 0x88c   :  { %v1917_v25 = vpop.permute.xlu1 %1916 }
 0x890   :  { %v1919_v26 = vpop.permute.xlu1 %1918 }
 0x891   :  { %1924 = vst.msk [vmem:[#allocation2 + $0x8] sm:$0xff] %vm1922_vm14, %v1919_v26 }
 0x894   :  { %v1736_v27 = vpop.permute.xlu1 %1735 }
 0x895   :  { %1742 = vst.msk [vmem:[#allocation2] sm:$0xff] %vm1741_vm13, %v1736_v27 }
 0x896   :  { %1923 = vst.msk [vmem:[#allocation2] sm:$0xff] %vm1922_vm14, %v1917_v25 }
 0x898   :  { %v2098_v30 = vpop.permute.xlu1 %2097 }
 0x899   :  { %2104 = vst.msk [vmem:[#allocation2] sm:$0xff] %vm2103_vm1, %v2098_v30 }
 0x89c   :  { %v2100_v31 = vpop.permute.xlu1 %2099 }
 0x89d   :  { %2105 = vst.msk [vmem:[#allocation2 + $0x8] sm:$0xff] %vm2103_vm1, %v2100_v31 }
 0x8a0   :  { %v2106_v28 = vld [vmem:[#allocation2] sm:$0xff] }
 0x8a1   :  { %v2115_v34 = vadd.f32 %v3226_v32, %v2106_v28 }
 0x8a3   :  { %v2119_v35 = vmin.f32 %v2115_v34, 0.0  ;;  %vm2117_vm4 = vcmp.gt.f32.partialorder %v2115_v34, 0.0 }
 0x8a4   :  { %v2107_v36 = vld [vmem:[#allocation2 + $0x8] sm:$0xff] }
 0x8a5   :  { %v2116_v38 = vadd.f32 %v3226_v32, %v2107_v36  ;;  %v2121_v41 = vmul.f32 1.442695, %v2119_v35 }
 0x8a7   :  { %v2120_v42 = vmin.f32 %v2116_v38, 0.0  ;;  %3675 = vpow2.f32 %v2121_v41  ;;  %vm2118_vm6 = vcmp.gt.f32.partialorder %v2116_v38, 0.0  ;;  %v2626_v41 = vld [vmem:[%s3175_s8] sm:$0xff]  ;;  %s3743_s8 = smov 30  }
 0x8a8   :  { %s3180_s11 = sld [smem:[%s4158_s0 + %s3743_s8]]  }
 0x8a9   :  { %v2123_v29 = vmul.f32 1.442695, %v2120_v42  ;;  %v3186_v42 = vld [vmem:[%s3158_s12] ss:$0 sm:$0xff] }
 0x8ab   :  { %3677 = vpow2.f32 %v2123_v29 }
 0x8b4   :  { %v3676_v44 = vpop.eup %3675 }
 0x8b5   :  { %v3227_v45 = vadd.f32 -1.0, %v3676_v44  ;;  %v76_v44 = vstv %s3176_s17 }
 0x8b6   :  { %77 = vst [vmem:[#allocation3] sm:$0x1] %v76_v44 }
 0x8b7   :  { %v2127_v46 = vsel %vm2117_vm4, %v2115_v34, %v3227_v45 }
 0x8b8   :  { %v3678_v47 = vpop.eup %3677  ;;  %3531 = vmatprep.mubr.msk.f32.mxu0 %vm1239_vm15, %v2127_v46  ;;  %v3236_v46 = vld [vmem:[%s3174_s25] ss:$0 sm:$0xff] }
 0x8b9   :  { %v3228_v10 = vadd.f32 -1.0, %v3678_v47 }
 0x8bb   :  { %v2128_v52 = vsel %vm2118_vm6, %v2116_v38, %v3228_v10 }
 0x8bc   :  { %3532 = vmatmul.mubr.msk.f32.vlgmr.msra.gmra.mxu0 %vm1239_vm15, %v2128_v52 }
 0x8bd   :  { %3557 = vmatprep.mubr.msk.f32.mxu0 %vm3707_vm0, %v3705_v1 }
 0x97c   :  { %v3533_v54 = vpop.f32.mrf.mxu0 }
 0x97e   :  { %v2209_v55 = vpop.f32.mrf.mxu0 }
 0x97f   :  { %3536 = vmatprep.mubr.msk.f32.mxu1 %vm334_vm5, %v2209_v55 }
 0x980   :  { %3537 = vmatmul.mubr.msk.f32.vlgmr.msra.gmra.mxu1 %vm334_vm5, %v3533_v54 }
 0x981   :  { %3540 = vmatpush3.xpose.msk.msra.mxu1 %vm334_vm5, %v3533_v54  ;;  %3543 = vmatprep.mubr.msk.f32.mxu1 %vm3707_vm0, %v3705_v1 }
 0x982   :  { %3541 = vmatprep.subr.mxu1 %v3705_v1 }
 0x985   :  { %3542 = vmatpush3.xpose.msk.msra.mxu1 %vm334_vm5, %v2209_v55 }
 0x986   :  { %3546 = vmatprep.subr.mxu1 %v3533_v54 }
 0x988   :  { %3544 = vmatmul.mubr.msk.f32.vlgmr.msra.gmra.mxu1 %vm334_vm5, %v2300_v48  ;;  %v2712_v48 = vld [vmem:[%s3177_s29] sm:$0xff] }
 0x989   :  { %3547 = vmatpush3.msra.mxu1 %v3533_v54 }
 0x98a   :  { %3548 = vmatprep.subr.mxu1 %v2209_v55 }
 0x98b   :  { %3549 = vmatpush3.msra.mxu1 %v2209_v55 }
 0x98c   :  { %3560 = vmatprep.subr.mxu1 %v3705_v1 }
 0xa40   :  { %v3538_v49 = vpop.f32.mrf.mxu1 }
 0xa41   :  { %2381 = vperm.xlu1 %3648, %v3538_v49   ;;  %v3207_v49 = vld [vmem:[%s3164_s3] ss:$0 sm:$0xff] }
 0xa42   :  { %v2291_v57 = vpop.f32.mrf.mxu1 }
 0xa43   :  { %2376 = vperm.xlu0 %3647, %v2291_v57  }
 0xa47   :  { %3649 = vset.pattern.permute.xlu0 %v3711_v5 }
 0xa48   :  { %v2370_v58 = vpop.f32.mrf.mxu1 }
 0xa49   :  { %v2387_v39 = vrot.slane %v2370_v58, %v1407_v43 }
 0xa4a   :  { %v3545_v59 = vpop.f32.mrf.mxu1 }
 0xa4b   :  { %v3241_v59 = vld [vmem:[#allocation3] ss:$0 sm:$0xff] }
 0xabc   :  { %v2382_v60 = vpop.permute.xlu1 %2381 }
 0xabd   :  { %v2389_v40 = vadd.f32 %v2387_v39, %v2382_v60 }
 0xabe   :  { %v2377_v61 = vpop.permute.xlu0 %2376 }
 0xabf   :  { %vm2391_vm15 = vcmp.gt.f32.partialorder %v2389_v40, 0.0  ;;  %v2393_v62 = vmul.f32 0.2, %v2389_v40  ;;  %v2388_v63 = vadd.f32 %v2387_v39, %v2377_v61 }
 0xac1   :  { %v2395_v51 = vsel %vm2391_vm15, %v2389_v40, %v2393_v62  ;;  %vm2390_vm8 = vcmp.gt.f32.partialorder %v2388_v63, 0.0  ;;  %v2392_v2 = vmul.f32 0.2, %v2388_v63 }
 0xac2   :  { %v2397_v3 = vsel %vm1142_vm7, %v2395_v51, -1e+30 }
 0xac3   :  { %v2394_v4 = vsel %vm2390_vm8, %v2388_v63, %v2392_v2  ;;  %v2399_v8 = vsel %vm166_vm2, %v2397_v3, -inf }
 0xac4   :  { %v2396_v5 = vsel %vm1141_vm3, %v2394_v4, -1e+30 }
 0xac5   :  { %v2398_v16 = vsel %vm166_vm2, %v2396_v5, -inf }
 0xac6   :  { %v2400_v43 = vmax.f32 %v2398_v16, %v2399_v8 }
 0xac8   :  { %v2401_v9 = vrot.slane %v2400_v43, 4 }
 0xaca   :  { %v2402_v12 = vmax.f32 %v2400_v43, %v2401_v9 }
 0xacc   :  { %v2403_v13 = vrot.slane %v2402_v12, 2 }
 0xace   :  { %v2404_v14 = vmax.f32 %v2402_v12, %v2403_v13 }
 0xad0   :  { %v2405_v7 = vrot.slane %v2404_v14, 1 }
 0xad2   :  { %v2406_v6 = vmax.f32 %v2404_v14, %v2405_v7 }
 0xad4   :  { %v2407_v18 = vsub.f32 %v2396_v5, %v2406_v6  ;;  %v2408_v19 = vsub.f32 %v2397_v3, %v2406_v6 }
 0xad6   :  { %v2409_v20 = vmul.f32 1.442695, %v2407_v18  ;;  %v2411_v56 = vmul.f32 1.442695, %v2408_v19 }
 0xad8   :  { %3679 = vpow2.f32 %v2409_v20 }
 0xad9   :  { %3681 = vpow2.f32 %v2411_v56 }
 0xae5   :  { %v3680_v21 = vpop.eup %3679 }
 0xae6   :  { %v3682_v50 = vpop.eup %3681  ;;  %v2413_v22 = vmul.f32 %v3680_v21, %v3984_v15  ;;  %v156_v15 = vld [vmem:[%s1_s4] sm:$0xff]  ;;  %s3742_s4 = smov 28  }
 0xae7   :  { %v2414_v23 = vmul.f32 %v3682_v50, %v3989_v33  ;;  %2548 = vperm.xlu0 %3649, %v156_v15   ;;  %s3178_s7 = sld [smem:[%s4158_s0 + %s3742_s4]]  }
 0xae8   :  { %v2415_v24 = vsel %vm166_vm2, %v2413_v22, 0.0 }
 0xae9   :  { %v2416_v25 = vsel %vm166_vm2, %v2414_v23, 0.0 }
 0xaea   :  { %v2417_v26 = vadd.f32 %v2416_v25, %v2415_v24  ;;  %v2902_v24 = vld [vmem:[%s3182_s15] sm:$0xff] }
 0xaeb   :  { %3650 = vset.pattern.permute.xlu0 %v3703_v0  ;;  %v4087_v0 = vadd.f32 %v3186_v42, %v3808_v17  ;;  %v2798_v17 = vld [vmem:[%s3179_s21] sm:$0xff] }
 0xaec   :  { %v2418_v27 = vrot.slane %v2417_v26, 4 }
 0xaed   :  { %v78_v58 = vstv %s3178_s7 }
 0xaee   :  { %v2419_v30 = vadd.f32 %v2418_v27, %v2417_v26  ;;  %79 = vst [vmem:[#allocation4] sm:$0x1] %v78_v58 }
 0xaf0   :  { %v2420_v31 = vrot.slane %v2419_v30, 2 }
 0xaf2   :  { %v2421_v32 = vadd.f32 %v2420_v31, %v2419_v30  ;;  %v2894_v30 = vld [vmem:[%s3181_s19] sm:$0xff] }
 0xaf4   :  { %v2422_v28 = vrot.slane %v2421_v32, 1 }
 0xaf5   :  { %v3243_v63 = vld [vmem:[#allocation4] ss:$0 sm:$0xff] }
 0xaf6   :  { %v2423_v34 = vadd.f32 %v2422_v28, %v2421_v32 }
 0xaf8   :  { %3683 = vrcp.f32 %v2423_v34  ;;  %v3056_v34 = vld [vmem:[%s3183_s22] sm:$0xff] }
 0xb05   :  { %v3684_v35 = vpop.eup %3683 }
 0xb06   :  { %v2425_v36 = vmul.f32 %v3684_v35, %v2413_v22  ;;  %v2426_v38 = vmul.f32 %v3684_v35, %v2414_v23 }
 0xb08   :  { %2434 = vxpose.xlu1.b32.start [1/2] (short) (narrow) %v2425_v36, 16 }
 0xb0c   :  { %2435 = vxpose.xlu1.b32.end [2/2] (short) (narrow) %v2426_v38, 16 }
 0xb62   :  { %v2549_v45 = vpop.permute.xlu0 %2548 }
 0xb63   :  { %vm2550_vm3 = vcmp.eq.s32.totalorder %v2549_v45, %v3793_v11  ;;  %v4118_v11 = vadd.f32 %v3207_v49, %v3923_v37  ;;  %v80_v37 = vstv %s3180_s11 }
 0xb64   :  { %v3239_v54 = vsel %vm2550_vm3, 1.0, %v3705_v1  ;;  %81 = vst [vmem:[#allocation5] sm:$0x1] %v80_v37 }
 0xb6b   :  { %v3245_v7 = vld [vmem:[#allocation5] ss:$0 sm:$0xff] }
 0xb84   :  { %v2450_v33 = vpop.trf.xlu1 }
 0xb85   :  { %3550 = vmatprep.mubr.msk.f32.mxu1 %vm166_vm2, %v2450_v33  ;;  %v82_v33 = vstv %s3184_s26 }
 0xb86   :  { %83 = vst [vmem:[#allocation6] sm:$0x1] %v82_v33 }
 0xb88   :  { %v2451_v29 = vpop.trf.xlu1 }
 0xb89   :  { %3551 = vmatmul.mubr.msk.f32.vlgmr.msra.gmra.mxu1 %vm166_vm2, %v2451_v29 }
 0xb8a   :  { %3561 = vmatpush3.msra.mxu1 %v2626_v41  ;;  %3562 = vmatprep.mubr.msk.f32.mxu1 %vm3707_vm0, %v3705_v1 }
 0xb8b   :  { %3570 = vmatprep.subr.mxu1 %v3705_v1 }
 0xb8d   :  { %3563 = vmatmul.mubr.msk.f32.vlgmr.msra.gmra.mxu1 %vm334_vm5, %v4087_v0 }
 0xb8e   :  { %3572 = vmatprep.mubr.msk.f32.mxu1 %vm3707_vm0, %v3705_v1  ;;  %3571 = vmatpush3.msra.mxu1 %v2798_v17 }
 0xb8f   :  { %3580 = vmatprep.subr.mxu1 %v3705_v1 }
 0xc49   :  { %v3552_v47 = vpop.f32.mrf.mxu1 }
 0xc4a   :  { %v2544_v10 = vadd.f32 %v3552_v47, %v3236_v46 }
 0xc4b   :  { %v2538_v52 = vpop.f32.mrf.mxu1 }
 0xc4c   :  { %v2539_v53 = vadd.f32 %v3236_v46, %v2538_v52  ;;  %3554 = vmatpush3.msra.mxu0 %v2544_v10 }
 0xc4d   :  { %3555 = vmatprep.subr.mxu0 %v3705_v1  ;;  %v2703_v55 = vpop.f32.mrf.mxu1 }
 0xc4e   :  { %3556 = vmatpush3.msra.mxu0 %v2539_v53  ;;  %v2704_v39 = vadd.f32 %v3241_v59, %v2703_v55 }
 0xc4f   :  { %3558 = vmatmul.mubr.msk.f32.vlgmr.msra.gmra.mxu0 %vm166_vm2, %v3239_v54  ;;  %v3564_v57 = vpop.f32.mrf.mxu1  ;;  %3565 = vmatprep.subr.mxu0 %v3705_v1 }
 0xc50   :  { %3566 = vmatpush3.msra.mxu0 %v2712_v48  ;;  %3567 = vmatprep.mubr.msk.f32.mxu0 %vm3707_vm0, %v3705_v1  ;;  %v2707_v60 = vsub.f32 0.0, %v2704_v39 }
 0xc51   :  { %3575 = vmatprep.subr.mxu0 %v3705_v1 }
 0xc52   :  { %v2708_v61 = vmul.f32 1.442695, %v2707_v60 }
 0xc53   :  { %3568 = vmatmul.mubr.msk.f32.vlgmr.msra.gmra.mxu0 %vm334_vm5, %v4118_v11 }
 0xc54   :  { %3577 = vmatprep.mubr.msk.f32.mxu0 %vm3707_vm0, %v3705_v1  ;;  %3685 = vpow2.f32 %v2708_v61  ;;  %3576 = vmatpush3.msra.mxu0 %v2902_v24 }
 0xc55   :  { %3585 = vmatprep.subr.mxu0 %v3705_v1 }
 0xc61   :  { %v3686_v8 = vpop.eup %3685 }
 0xc62   :  { %v2710_v16 = vadd.f32 1.0, %v3686_v8 }
 0xd0f   :  { %v2622_v40 = vpop.f32.mrf.mxu0 }
 0xd10   :  { %3573 = vmatmul.mubr.msk.f32.vlgmr.msra.gmra.mxu1 %vm334_vm5, %v2622_v40 }
 0xd11   :  { %v3559_v62 = vpop.f32.mrf.mxu0  ;;  %3582 = vmatprep.mubr.msk.f32.mxu1 %vm3707_vm0, %v3705_v1  ;;  %3581 = vmatpush3.msra.mxu1 %v2894_v30 }
 0xd13   :  { %v2789_v51 = vpop.f32.mrf.mxu0 }
 0xd14   :  { %v2790_v2 = vadd.f32 %v3243_v63, %v2789_v51 }
 0xd15   :  { %v3569_v3 = vpop.f32.mrf.mxu0 }
 0xd16   :  { %v2793_v4 = vsub.f32 0.0, %v2790_v2 }
 0xd18   :  { %v2794_v5 = vmul.f32 1.442695, %v2793_v4 }
 0xd1a   :  { %3687 = vpow2.f32 %v2794_v5 }
 0xd1b   :  { %3689 = vrcp.f32 %v2710_v16 }
 0xd27   :  { %v3688_v43 = vpop.eup %3687 }
 0xd28   :  { %v2796_v9 = vadd.f32 1.0, %v3688_v43  ;;  %v3690_v12 = vpop.eup %3689 }
 0xd2a   :  { %3691 = vrcp.f32 %v2796_v9 }
 0xd37   :  { %v3692_v13 = vpop.eup %3691 }
 0xd38   :  { %v2884_v14 = vadd.f32 %v3692_v13, %v3690_v12 }
 0xdd0   :  { %v2875_v6 = vpop.f32.mrf.mxu1 }
 0xdd1   :  { %v2876_v18 = vadd.f32 %v3245_v7, %v2875_v6 }
 0xdd2   :  { %v3574_v19 = vpop.f32.mrf.mxu1 }
 0xdd3   :  { %v2879_v20 = vsub.f32 0.0, %v2876_v18 }
 0xdd5   :  { %v2880_v56 = vmul.f32 1.442695, %v2879_v20 }
 0xdd7   :  { %3693 = vpow2.f32 %v2880_v56 }
 0xde4   :  { %v3694_v21 = vpop.eup %3693 }
 0xde5   :  { %v2882_v50 = vadd.f32 1.0, %v3694_v21 }
 0xde7   :  { %3695 = vrcp.f32 %v2882_v50 }
 0xdf4   :  { %v3696_v22 = vpop.eup %3695 }
 0xdf5   :  { %v2885_v23 = vadd.f32 %v3696_v22, %v2884_v14 }
 0xdf7   :  { %3697 = vrcp.f32 %v2885_v23 }
 0xe04   :  { %v3698_v25 = vpop.eup %3697 }
 0xe05   :  { %v2895_v26 = vmul.f32 %v3698_v25, %v3692_v13  ;;  %v2887_v27 = vmul.f32 %v3698_v25, %v3690_v12  ;;  %v3049_v31 = vmul.f32 %v3698_v25, %v3696_v22 }
 0xe07   :  { %2898 = vperm.xlu0 %3650, %v2895_v26  }
 0xe0b   :  { %2890 = vperm.xlu0 %3650, %v2887_v27  }
 0xe0f   :  { %3052 = vperm.xlu0 %3650, %v3049_v31  }
 0xe82   :  { %v2899_v32 = vpop.permute.xlu0 %2898 }
 0xe83   :  { %v2901_v28 = vmul.f32 %v2899_v32, %v4118_v11 }
 0xe85   :  { %3578 = vmatmul.mubr.msk.f32.vlgmr.msra.gmra.mxu0 %vm334_vm5, %v2901_v28 }
 0xe86   :  { %v2891_v35 = vpop.permute.xlu0 %2890  ;;  %3586 = vmatpush3.msra.mxu0 %v3056_v34  ;;  %3587 = vmatprep.mubr.msk.f32.mxu0 %vm3707_vm0, %v3705_v1  ;;  %vm3145_vm0 = vcmask 7168  }
 0xe87   :  { %v2893_v36 = vmul.f32 %v2891_v35, %v4087_v0  ;;  %v3250_v0 = vld [vmem:[#allocation6] ss:$0 sm:$0xff] }
 0xe89   :  { %3583 = vmatmul.mubr.msk.f32.vlgmr.msra.gmra.mxu1 %vm334_vm5, %v2893_v36 }
 0xe8a   :  { %v3053_v38 = vpop.permute.xlu0 %3052 }
 0xe8b   :  { %v3055_v15 = vmul.f32 %v3053_v38, %v2622_v40 }
 0xe8d   :  { %3588 = vmatmul.mubr.msk.f32.vlgmr.msra.gmra.mxu0 %vm334_vm5, %v3055_v15 }
 0xf45   :  { %v2972_v41 = vpop.f32.mrf.mxu0 }
 0xf47   :  { %v3579_v42 = vpop.f32.mrf.mxu0 }
 0xf49   :  { %v3045_v29 = vpop.f32.mrf.mxu1 }
 0xf4a   :  { %v3046_v1 = vadd.f32 %v3045_v29, %v2972_v41 }
 0xf4b   :  { %v3584_v44 = vpop.f32.mrf.mxu1 }
 0xf4d   :  { %v3126_v17 = vpop.f32.mrf.mxu0 }
 0xf4e   :  { %v3130_v45 = vadd.f32 %v3126_v17, %v3046_v1 }
 0xf4f   :  { %v3589_v46 = vpop.f32.mrf.mxu0 }
 0xf50   :  { %v3138_v47 = vadd.f32 %v3250_v0, %v3130_v45 }
 0xf52   :  { %v3139_v10 = vsub.f32 %v3138_v47, %v3138_v47 }
 0xf54   :  { %v3140_v52 = vmul.f32 1.442695, %v3139_v10 }
 0xf56   :  { %3699 = vpow2.f32 %v3140_v52 }
 0xf63   :  { %v3700_v53 = vpop.eup %3699 }
 0xf64   :  { %3701 = vrcp.f32 %v3700_v53 }
 0xf71   :  { %v3702_v54 = vpop.eup %3701 }
 0xf72   :  { %v3144_v55 = vmul.f32 %v3702_v54, %v3700_v53 }
 0xf74   :  { %3146 = vst.msk [vmem:[%s3185_s30] sm:$0xff] %vm3145_vm0, %v3144_v55 }

</bundles_post_ra>
